<compile_context>
chip_gen: v6e
topology: v6e:2x2x1
jax: 0.10.0
libtpu: 0.0.40
codegen_flags: <defaults>
</compile_context>

<pallas_src>
import jax
import jax.numpy as jnp
from jax.experimental import pallas as pl
from jax.experimental.pallas import tpu as pltpu


def _round_up(n: int, m: int) -> int:
    return ((n + m - 1) // m) * m


def _device_kind() -> str:
    try:
        return jax.devices()[0].device_kind.lower()
    except Exception:
        return ""


def _default_compute_dtype():
    """bf16 MXU operands on v6e / v7x (f32 accumulate kept); f32 elsewhere (v5e-safe)."""
    kind = _device_kind()
    if "v6" in kind or "v7" in kind:
        return jnp.bfloat16
    return jnp.float32


def _default_min_grid_steps() -> int:
    """v7x has 2 TensorCores sharing the parallel grid axis: want >= 2 grid steps."""
    return 2 if "v7" in _device_kind() else 1


def mlp_kernel(x_ref, w1_ref, b1_ref, w2_ref, b2_ref, w3_ref, b3_ref, o_ref):
    """One batch tile: fused (x @ W1 + b1).relu() @ W2 + b2 ... @ W3 + b3.

    MXU operands in the weights' dtype (f32 or bf16); accumulation in f32;
    bias add + ReLU on the VPU in f32 (required on v5e, accuracy-preserving everywhere).
    """
    # In-kernel cast of x to the MXU operand dtype (free VPU op; avoids an extra
    # wrapper-side HBM read+write pass over x).
    x = x_ref[...].astype(w1_ref.dtype)

    # Layer 1: Linear + ReLU
    h1 = jnp.dot(x, w1_ref[...], preferred_element_type=jnp.float32) + b1_ref[...]
    h1 = jnp.maximum(h1, 0.0).astype(w2_ref.dtype)

    # Layer 2: Linear + ReLU
    h2 = jnp.dot(h1, w2_ref[...], preferred_element_type=jnp.float32) + b2_ref[...]
    h2 = jnp.maximum(h2, 0.0).astype(w3_ref.dtype)

    # Layer 3: Linear (no activation)
    out = jnp.dot(h2, w3_ref[...], preferred_element_type=jnp.float32) + b3_ref[...]
    o_ref[...] = out.astype(o_ref.dtype)


def prepare_params(params, *, compute_dtype=None):
    """Pad every feature axis to a multiple of 128 (lane-dense, zero padding is
    mathematically transparent) and cast weights to the MXU operand dtype ONCE.

    Do this at init time and reuse the result across forward calls — re-padding /
    re-casting the six parameter arrays per call costs more HBM traffic than the
    kernel itself at these sizes.
    """
    if compute_dtype is None:
        compute_dtype = _default_compute_dtype()

    w1, b1, w2, b2, w3, b3 = (params[k] for k in ("w1", "b1", "w2", "b2", "w3", "b3"))
    in_f, hid_f = w1.shape
    out_f = w3.shape[1]
    in_p, hid_p, out_p = (_round_up(d, 128) for d in (in_f, hid_f, out_f))

    def pad2(a, rows, cols):
        return jnp.pad(a, ((0, rows - a.shape[0]), (0, cols - a.shape[1])))

    prepped = {
        "w1": pad2(w1, in_p, hid_p).astype(compute_dtype),
        "b1": pad2(b1, 1, hid_p).astype(jnp.float32),   # biases stay f32 (VPU epilogue)
        "w2": pad2(w2, hid_p, hid_p).astype(compute_dtype),
        "b2": pad2(b2, 1, hid_p).astype(jnp.float32),
        "w3": pad2(w3, hid_p, out_p).astype(compute_dtype),
        "b3": pad2(b3, 1, out_p).astype(jnp.float32),
    }
    meta = {
        "in_f": in_f, "hid_f": hid_f, "out_f": out_f,
        "in_p": in_p, "hid_p": hid_p, "out_p": out_p,
        "compute_dtype": compute_dtype,
    }
    return prepped, meta


def neural_net_forward(x, prepped, meta, *, block_batch=512, weight_buffers=1,
                       min_grid_steps=None):
    """x: [B, input_size] float32. prepped/meta: output of prepare_params()."""
    B, in_f = x.shape
    assert in_f == meta["in_f"], "x feature dim does not match prepared params"
    in_p, hid_p, out_p, out_f = meta["in_p"], meta["hid_p"], meta["out_p"], meta["out_f"]
    compute_dtype = meta["compute_dtype"]

    if min_grid_steps is None:
        min_grid_steps = _default_min_grid_steps()

    # Batch tile: sublane-aligned for the compute dtype (8 rows f32, 16 rows bf16)
    # so every load/store is an unmasked full vreg and bf16 sublane-packs cleanly.
    sublane = 16 if compute_dtype == jnp.bfloat16 else 8
    tb = _round_up(max(1, min(block_batch, B)), sublane)
    # v7x: if the batch allows, split into >= min_grid_steps tiles so the "parallel"
    # grid axis actually feeds both TensorCores.
    if min_grid_steps > 1 and _round_up(B, sublane) >= min_grid_steps * sublane:
        tb = min(tb, _round_up(pl.cdiv(B, min_grid_steps), sublane))
    B_p = tb * pl.cdiv(B, tb)

    # x: pad batch to a tile multiple and features to the lane-dense width.
    # NOTE: no dtype cast here — the cast to the MXU operand dtype is done in-kernel.
    xp = jnp.pad(x, ((0, B_p - B), (0, in_p - in_f)))

    # Weights/biases: constant block index across the batch grid -> VMEM-resident,
    # no redundant DMA across steps. Buffered(1) removes the second (useless) buffer.
    def pinned(shape):
        if weight_buffers is not None:
            return pl.BlockSpec(shape, lambda i: (0, 0),
                                pipeline_mode=pl.Buffered(weight_buffers))
        return pl.BlockSpec(shape, lambda i: (0, 0))

    out_padded = pl.pallas_call(
        mlp_kernel,
        out_shape=jax.ShapeDtypeStruct((B_p, out_p), jnp.float32),
        grid=(B_p // tb,),
        in_specs=[
            pl.BlockSpec((tb, in_p), lambda i: (i, 0)),   # x: tiled over batch
            pinned((in_p, hid_p)), pinned((1, hid_p)),    # w1, b1 (pinned)
            pinned((hid_p, hid_p)), pinned((1, hid_p)),   # w2, b2 (pinned)
            pinned((hid_p, out_p)), pinned((1, out_p)),   # w3, b3 (pinned)
        ],
        out_specs=pl.BlockSpec((tb, out_p), lambda i: (i, 0)),
        compiler_params=pltpu.CompilerParams(
            # Independent batch tiles -> shard across TensorCores (v7x: 2 TC/chip).
            dimension_semantics=("parallel",),
            # Conservative budget; fits v5e/v6e (128 MiB) and v7x (64 MiB). Raise on
            # v5e/v6e only if tb/hidden grow enough that pipelining gets squeezed.
            vmem_limit_bytes=32 * 1024 * 1024,
        ),
    )(xp, prepped["w1"], prepped["b1"], prepped["w2"], prepped["b2"],
      prepped["w3"], prepped["b3"])

    # Strip batch and output-lane padding.
    return out_padded[:B, :out_f]


def init_params(key, input_size, hidden_size, output_size):
    """Deterministic init mimicking nn.Linear's U(-1/sqrt(fan_in), 1/sqrt(fan_in)).
    Weights stored as [in_features, out_features] (transposed vs. PyTorch)."""
    ks = jax.random.split(key, 6)

    def linear(kw, kb, fan_in, fan_out):
        bound = 1.0 / jnp.sqrt(fan_in)
        w = jax.random.uniform(kw, (fan_in, fan_out), jnp.float32, -bound, bound)
        b = jax.random.uniform(kb, (1, fan_out), jnp.float32, -bound, bound)
        return w, b

    w1, b1 = linear(ks[0], ks[1], input_size, hidden_size)
    w2, b2 = linear(ks[2], ks[3], hidden_size, hidden_size)
    w3, b3 = linear(ks[4], ks[5], hidden_size, output_size)
    return {"w1": w1, "b1": b1, "w2": w2, "b2": b2, "w3": w3, "b3": b3}


def _reference(x, params):
    h1 = jnp.maximum(x @ params["w1"] + params["b1"], 0.0)
    h2 = jnp.maximum(h1 @ params["w2"] + params["b2"], 0.0)
    return h2 @ params["w3"] + params["b3"]


if __name__ == "__main__":
    input_size, hidden_size, output_size = 32, 64, 16
    batch = 48  # not a multiple of the batch tile -> exercises padding + multi-step grid

    key = jax.random.PRNGKey(0)
    k_x, k_p = jax.random.split(key)

    x = jax.random.normal(k_x, (batch, input_size), jnp.float32)
    params = init_params(k_p, input_size, hidden_size, output_size)
    ref = _reference(x, params)

    # --- f32 operand path (tight tolerance); small block_batch -> >1 grid step. ---
    prepped_f32, meta_f32 = prepare_params(params, compute_dtype=jnp.float32)
    try:
        out = jax.block_until_ready(
            neural_net_forward(x, prepped_f32, meta_f32, block_batch=32, weight_buffers=1))
        wb = 1
    except Exception:
        # pipeline_mode=pl.Buffered(1) not supported by this jax build -> default buffering.
        wb = None
        out = jax.block_until_ready(
            neural_net_forward(x, prepped_f32, meta_f32, block_batch=32, weight_buffers=wb))

    assert out.shape == (batch, output_size)
    assert jnp.allclose(out, ref, atol=1e-3, rtol=1e-3), \
        f"f32 mismatch, max abs err {jnp.max(jnp.abs(out - ref))}"

    # --- Chip-default operand dtype (bf16 on v6e/v7x, f32 on v5e); default tiling. ---
    prepped_auto, meta_auto = prepare_params(params)
    out_auto = jax.block_until_ready(
        neural_net_forward(x, prepped_auto, meta_auto, weight_buffers=wb))
    assert out_auto.shape == (batch, output_size)
    assert jnp.allclose(out_auto, ref, atol=2e-1, rtol=2e-1), \
        f"auto-dtype sanity mismatch, max abs err {jnp.max(jnp.abs(out_auto - ref))}"

    print("KERNEL_OK")
</pallas_src>

<mosaic_0001>
module attributes {stable_mosaic.version = 11 : i64} {
  func.func @mlp_kernel(%arg0: i32, %arg1: memref<32x128xf32, #tpu.memory_space<vmem>>, %arg2: memref<128x128xf32, #tpu.memory_space<vmem>>, %arg3: memref<1x128xf32, #tpu.memory_space<vmem>>, %arg4: memref<128x128xf32, #tpu.memory_space<vmem>>, %arg5: memref<1x128xf32, #tpu.memory_space<vmem>>, %arg6: memref<128x128xf32, #tpu.memory_space<vmem>>, %arg7: memref<1x128xf32, #tpu.memory_space<vmem>>, %arg8: memref<32x128xf32, #tpu.memory_space<vmem>>) attributes {dimension_semantics = [#tpu.dimension_semantics<parallel>], iteration_bounds = array<i64: 2>, scalar_prefetch = 0 : i64, scratch_operands = 0 : i64, tpu.core_type = #tpu.core_type<tc>, window_params = [{transform_indices = @transform_0, window_bounds = array<i64: 32, 128>}, {pipeline_mode = #tpu.pipeline_mode<synchronous>, transform_indices = @transform_1, window_bounds = array<i64: 128, 128>}, {pipeline_mode = #tpu.pipeline_mode<synchronous>, transform_indices = @transform_2, window_bounds = array<i64: 1, 128>}, {pipeline_mode = #tpu.pipeline_mode<synchronous>, transform_indices = @transform_3, window_bounds = array<i64: 128, 128>}, {pipeline_mode = #tpu.pipeline_mode<synchronous>, transform_indices = @transform_4, window_bounds = array<i64: 1, 128>}, {pipeline_mode = #tpu.pipeline_mode<synchronous>, transform_indices = @transform_5, window_bounds = array<i64: 128, 128>}, {pipeline_mode = #tpu.pipeline_mode<synchronous>, transform_indices = @transform_6, window_bounds = array<i64: 1, 128>}, {transform_indices = @transform_7, window_bounds = array<i64: 32, 128>}]} {
    %c0 = arith.constant 0 : index
    %c0_0 = arith.constant 0 : index
    %0 = vector.load %arg1[%c0, %c0_0] : memref<32x128xf32, #tpu.memory_space<vmem>>, vector<32x128xf32>
    %c0_1 = arith.constant 0 : index
    %c0_2 = arith.constant 0 : index
    %1 = vector.load %arg2[%c0_1, %c0_2] : memref<128x128xf32, #tpu.memory_space<vmem>>, vector<128x128xf32>
    %cst = arith.constant dense<0.000000e+00> : vector<32x128xf32>
    %2 = tpu.matmul %0, %1, %cst {dimension_numbers = #tpu.dot_dimension_numbers<[1], [0], [0], [1], [0, 0, 1, 1], [], []>} : vector<32x128xf32>, vector<128x128xf32>, vector<32x128xf32> -> vector<32x128xf32>
    %c0_3 = arith.constant 0 : index
    %c0_4 = arith.constant 0 : index
    %3 = vector.load %arg3[%c0_3, %c0_4] : memref<1x128xf32, #tpu.memory_space<vmem>>, vector<1x128xf32>
    %4 = vector.broadcast %3 : vector<1x128xf32> to vector<32x128xf32>
    %5 = arith.addf %2, %4 : vector<32x128xf32>
    %cst_5 = arith.constant 0.000000e+00 : f32
    %6 = vector.broadcast %cst_5 : f32 to vector<32x128xf32>
    %7 = arith.maximumf %5, %6 : vector<32x128xf32>
    %c0_6 = arith.constant 0 : index
    %c0_7 = arith.constant 0 : index
    %8 = vector.load %arg4[%c0_6, %c0_7] : memref<128x128xf32, #tpu.memory_space<vmem>>, vector<128x128xf32>
    %cst_8 = arith.constant dense<0.000000e+00> : vector<32x128xf32>
    %9 = tpu.matmul %7, %8, %cst_8 {dimension_numbers = #tpu.dot_dimension_numbers<[1], [0], [0], [1], [0, 0, 1, 1], [], []>} : vector<32x128xf32>, vector<128x128xf32>, vector<32x128xf32> -> vector<32x128xf32>
    %c0_9 = arith.constant 0 : index
    %c0_10 = arith.constant 0 : index
    %10 = vector.load %arg5[%c0_9, %c0_10] : memref<1x128xf32, #tpu.memory_space<vmem>>, vector<1x128xf32>
    %11 = vector.broadcast %10 : vector<1x128xf32> to vector<32x128xf32>
    %12 = arith.addf %9, %11 : vector<32x128xf32>
    %cst_11 = arith.constant 0.000000e+00 : f32
    %13 = vector.broadcast %cst_11 : f32 to vector<32x128xf32>
    %14 = arith.maximumf %12, %13 : vector<32x128xf32>
    %c0_12 = arith.constant 0 : index
    %c0_13 = arith.constant 0 : index
    %15 = vector.load %arg6[%c0_12, %c0_13] : memref<128x128xf32, #tpu.memory_space<vmem>>, vector<128x128xf32>
    %cst_14 = arith.constant dense<0.000000e+00> : vector<32x128xf32>
    %16 = tpu.matmul %14, %15, %cst_14 {dimension_numbers = #tpu.dot_dimension_numbers<[1], [0], [0], [1], [0, 0, 1, 1], [], []>} : vector<32x128xf32>, vector<128x128xf32>, vector<32x128xf32> -> vector<32x128xf32>
    %c0_15 = arith.constant 0 : index
    %c0_16 = arith.constant 0 : index
    %17 = vector.load %arg7[%c0_15, %c0_16] : memref<1x128xf32, #tpu.memory_space<vmem>>, vector<1x128xf32>
    %18 = vector.broadcast %17 : vector<1x128xf32> to vector<32x128xf32>
    %19 = arith.addf %16, %18 : vector<32x128xf32>
    %c0_17 = arith.constant 0 : index
    %c0_18 = arith.constant 0 : index
    %20 = vector.load %arg8[%c0_17, %c0_18] : memref<32x128xf32, #tpu.memory_space<vmem>>, vector<32x128xf32>
    tpu.vector_store %arg8[%c0_17, %c0_18], %19 {strides = array<i32>} : memref<32x128xf32, #tpu.memory_space<vmem>>, vector<32x128xf32>,
    return
  }
  func.func @transform_0(%arg0: i32) -> (i32, i32) {
    %c0_i32 = arith.constant 0 : i32
    %c0_i32_0 = arith.constant 0 : i32
    return %arg0, %c0_i32 : i32, i32
  }
  func.func @transform_1(%arg0: i32) -> (i32, i32) {
    %c0_i32 = arith.constant 0 : i32
    %c0_i32_0 = arith.constant 0 : i32
    %c0_i32_1 = arith.constant 0 : i32
    return %c0_i32, %c0_i32_0 : i32, i32
  }
  func.func @transform_2(%arg0: i32) -> (i32, i32) {
    %c0_i32 = arith.constant 0 : i32
    %c0_i32_0 = arith.constant 0 : i32
    %c0_i32_1 = arith.constant 0 : i32
    return %c0_i32, %c0_i32_0 : i32, i32
  }
  func.func @transform_3(%arg0: i32) -> (i32, i32) {
    %c0_i32 = arith.constant 0 : i32
    %c0_i32_0 = arith.constant 0 : i32
    %c0_i32_1 = arith.constant 0 : i32
    return %c0_i32, %c0_i32_0 : i32, i32
  }
  func.func @transform_4(%arg0: i32) -> (i32, i32) {
    %c0_i32 = arith.constant 0 : i32
    %c0_i32_0 = arith.constant 0 : i32
    %c0_i32_1 = arith.constant 0 : i32
    return %c0_i32, %c0_i32_0 : i32, i32
  }
  func.func @transform_5(%arg0: i32) -> (i32, i32) {
    %c0_i32 = arith.constant 0 : i32
    %c0_i32_0 = arith.constant 0 : i32
    %c0_i32_1 = arith.constant 0 : i32
    return %c0_i32, %c0_i32_0 : i32, i32
  }
  func.func @transform_6(%arg0: i32) -> (i32, i32) {
    %c0_i32 = arith.constant 0 : i32
    %c0_i32_0 = arith.constant 0 : i32
    %c0_i32_1 = arith.constant 0 : i32
    return %c0_i32, %c0_i32_0 : i32, i32
  }
  func.func @transform_7(%arg0: i32) -> (i32, i32) {
    %c0_i32 = arith.constant 0 : i32
    %c0_i32_0 = arith.constant 0 : i32
    return %arg0, %c0_i32 : i32, i32
  }
}

module attributes {stable_mosaic.version = 11 : i64} {
  func.func @mlp_kernel(%arg0: i32, %arg1: memref<32x128xf32, #tpu.memory_space<vmem>>, %arg2: memref<128x128xf32, #tpu.memory_space<vmem>>, %arg3: memref<1x128xf32, #tpu.memory_space<vmem>>, %arg4: memref<128x128xf32, #tpu.memory_space<vmem>>, %arg5: memref<1x128xf32, #tpu.memory_space<vmem>>, %arg6: memref<128x128xf32, #tpu.memory_space<vmem>>, %arg7: memref<1x128xf32, #tpu.memory_space<vmem>>, %arg8: memref<32x128xf32, #tpu.memory_space<vmem>>) attributes {dimension_semantics = [#tpu.dimension_semantics<parallel>], iteration_bounds = array<i64: 2>, scalar_prefetch = 0 : i64, scratch_operands = 0 : i64, tpu.core_type = #tpu.core_type<tc>, window_params = [{transform_indices = @transform_0, window_bounds = array<i64: 32, 128>}, {pipeline_mode = #tpu.pipeline_mode<synchronous>, transform_indices = @transform_1, window_bounds = array<i64: 128, 128>}, {pipeline_mode = #tpu.pipeline_mode<synchronous>, transform_indices = @transform_2, window_bounds = array<i64: 1, 128>}, {pipeline_mode = #tpu.pipeline_mode<synchronous>, transform_indices = @transform_3, window_bounds = array<i64: 128, 128>}, {pipeline_mode = #tpu.pipeline_mode<synchronous>, transform_indices = @transform_4, window_bounds = array<i64: 1, 128>}, {pipeline_mode = #tpu.pipeline_mode<synchronous>, transform_indices = @transform_5, window_bounds = array<i64: 128, 128>}, {pipeline_mode = #tpu.pipeline_mode<synchronous>, transform_indices = @transform_6, window_bounds = array<i64: 1, 128>}, {transform_indices = @transform_7, window_bounds = array<i64: 32, 128>}]} {
    %c0 = arith.constant 0 : index
    %c0_0 = arith.constant 0 : index
    %0 = vector.load %arg1[%c0, %c0_0] : memref<32x128xf32, #tpu.memory_space<vmem>>, vector<32x128xf32>
    %c0_1 = arith.constant 0 : index
    %c0_2 = arith.constant 0 : index
    %1 = vector.load %arg2[%c0_1, %c0_2] : memref<128x128xf32, #tpu.memory_space<vmem>>, vector<128x128xf32>
    %cst = arith.constant dense<0.000000e+00> : vector<32x128xf32>
    %2 = tpu.matmul %0, %1, %cst {dimension_numbers = #tpu.dot_dimension_numbers<[1], [0], [0], [1], [0, 0, 1, 1], [], []>} : vector<32x128xf32>, vector<128x128xf32>, vector<32x128xf32> -> vector<32x128xf32>
    %c0_3 = arith.constant 0 : index
    %c0_4 = arith.constant 0 : index
    %3 = vector.load %arg3[%c0_3, %c0_4] : memref<1x128xf32, #tpu.memory_space<vmem>>, vector<1x128xf32>
    %4 = vector.broadcast %3 : vector<1x128xf32> to vector<32x128xf32>
    %5 = arith.addf %2, %4 : vector<32x128xf32>
    %cst_5 = arith.constant 0.000000e+00 : f32
    %6 = vector.broadcast %cst_5 : f32 to vector<32x128xf32>
    %7 = arith.maximumf %5, %6 : vector<32x128xf32>
    %c0_6 = arith.constant 0 : index
    %c0_7 = arith.constant 0 : index
    %8 = vector.load %arg4[%c0_6, %c0_7] : memref<128x128xf32, #tpu.memory_space<vmem>>, vector<128x128xf32>
    %cst_8 = arith.constant dense<0.000000e+00> : vector<32x128xf32>
    %9 = tpu.matmul %7, %8, %cst_8 {dimension_numbers = #tpu.dot_dimension_numbers<[1], [0], [0], [1], [0, 0, 1, 1], [], []>} : vector<32x128xf32>, vector<128x128xf32>, vector<32x128xf32> -> vector<32x128xf32>
    %c0_9 = arith.constant 0 : index
    %c0_10 = arith.constant 0 : index
    %10 = vector.load %arg5[%c0_9, %c0_10] : memref<1x128xf32, #tpu.memory_space<vmem>>, vector<1x128xf32>
    %11 = vector.broadcast %10 : vector<1x128xf32> to vector<32x128xf32>
    %12 = arith.addf %9, %11 : vector<32x128xf32>
    %cst_11 = arith.constant 0.000000e+00 : f32
    %13 = vector.broadcast %cst_11 : f32 to vector<32x128xf32>
    %14 = arith.maximumf %12, %13 : vector<32x128xf32>
    %c0_12 = arith.constant 0 : index
    %c0_13 = arith.constant 0 : index
    %15 = vector.load %arg6[%c0_12, %c0_13] : memref<128x128xf32, #tpu.memory_space<vmem>>, vector<128x128xf32>
    %cst_14 = arith.constant dense<0.000000e+00> : vector<32x128xf32>
    %16 = tpu.matmul %14, %15, %cst_14 {dimension_numbers = #tpu.dot_dimension_numbers<[1], [0], [0], [1], [0, 0, 1, 1], [], []>} : vector<32x128xf32>, vector<128x128xf32>, vector<32x128xf32> -> vector<32x128xf32>
    %c0_15 = arith.constant 0 : index
    %c0_16 = arith.constant 0 : index
    %17 = vector.load %arg7[%c0_15, %c0_16] : memref<1x128xf32, #tpu.memory_space<vmem>>, vector<1x128xf32>
    %18 = vector.broadcast %17 : vector<1x128xf32> to vector<32x128xf32>
    %19 = arith.addf %16, %18 : vector<32x128xf32>
    %c0_17 = arith.constant 0 : index
    %c0_18 = arith.constant 0 : index
    %20 = vector.load %arg8[%c0_17, %c0_18] : memref<32x128xf32, #tpu.memory_space<vmem>>, vector<32x128xf32>
    tpu.vector_store %arg8[%c0_17, %c0_18], %19 {strides = array<i32>} : memref<32x128xf32, #tpu.memory_space<vmem>>, vector<32x128xf32>,
    return
  }
  func.func @transform_0(%arg0: i32) -> (i32, i32) {
    %c0_i32 = arith.constant 0 : i32
    %c0_i32_0 = arith.constant 0 : i32
    return %arg0, %c0_i32 : i32, i32
  }
  func.func @transform_1(%arg0: i32) -> (i32, i32) {
    %c0_i32 = arith.constant 0 : i32
    %c0_i32_0 = arith.constant 0 : i32
    %c0_i32_1 = arith.constant 0 : i32
    return %c0_i32, %c0_i32_0 : i32, i32
  }
  func.func @transform_2(%arg0: i32) -> (i32, i32) {
    %c0_i32 = arith.constant 0 : i32
    %c0_i32_0 = arith.constant 0 : i32
    %c0_i32_1 = arith.constant 0 : i32
    return %c0_i32, %c0_i32_0 : i32, i32
  }
  func.func @transform_3(%arg0: i32) -> (i32, i32) {
    %c0_i32 = arith.constant 0 : i32
    %c0_i32_0 = arith.constant 0 : i32
    %c0_i32_1 = arith.constant 0 : i32
    return %c0_i32, %c0_i32_0 : i32, i32
  }
  func.func @transform_4(%arg0: i32) -> (i32, i32) {
    %c0_i32 = arith.constant 0 : i32
    %c0_i32_0 = arith.constant 0 : i32
    %c0_i32_1 = arith.constant 0 : i32
    return %c0_i32, %c0_i32_0 : i32, i32
  }
  func.func @transform_5(%arg0: i32) -> (i32, i32) {
    %c0_i32 = arith.constant 0 : i32
    %c0_i32_0 = arith.constant 0 : i32
    %c0_i32_1 = arith.constant 0 : i32
    return %c0_i32, %c0_i32_0 : i32, i32
  }
  func.func @transform_6(%arg0: i32) -> (i32, i32) {
    %c0_i32 = arith.constant 0 : i32
    %c0_i32_0 = arith.constant 0 : i32
    %c0_i32_1 = arith.constant 0 : i32
    return %c0_i32, %c0_i32_0 : i32, i32
  }
  func.func @transform_7(%arg0: i32) -> (i32, i32) {
    %c0_i32 = arith.constant 0 : i32
    %c0_i32_0 = arith.constant 0 : i32
    return %arg0, %c0_i32 : i32, i32
  }
}

</mosaic_0001>

<bundles_post_ra>
// kernel: tpu_custom_call.1
= control target key start
LH: loop header
LB: loop body
LE: loop exit
PB: predicated region body
PF: predicated region fallthrough
CT: control target
= control target key end

     0   :  { %s1571_s0 = inlined_call_operand.hbm [shape: f32[64,128], index: 0, kind: input, shape index: {}]   ;;  %s1572_s1 = inlined_call_operand.hbm [shape: f32[128,128], index: 1, kind: input, shape index: {}]   ;;  %s1573_s2 = inlined_call_operand.vmem [shape: f32[1,128], index: 2, kind: input, shape index: {}]   ;;  %s1574_s3 = inlined_call_operand.hbm [shape: f32[128,128], index: 3, kind: input, shape index: {}]   ;;  %s1575_s4 = inlined_call_operand.vmem [shape: f32[1,128], index: 4, kind: input, shape index: {}]   ;;  %s1576_s5 = inlined_call_operand.hbm [shape: f32[128,128], index: 5, kind: input, shape index: {}]   ;;  %s1577_s6 = inlined_call_operand.vmem [shape: f32[1,128], index: 6, kind: input, shape index: {}]   ;;  %s1578_s7 = inlined_call_operand.hbm [shape: f32[64,128], index: 7, kind: output, shape index: {}]  }
   0x1   :  { %1585 = sst [smem:[#allocation15_spill]] %s1572_s1 }
   0x2   :  { %12 = vsyncpa [#allocation3], 0 }
   0x3   :  { %14 = vsyncpa [#allocation3 + $0x1], 0 }
   0x4   :  { %15 = vsyncpa [#allocation6], 0 }
   0x5   :  { %16 = vsyncpa [#allocation9], 0 }
   0x6   :  { %17 = vsyncpa [#allocation4], 0 }
   0x7   :  { %19 = vsyncpa [#allocation4 + $0x1], 0  ;;  %s1340_s24 = smov 0   ;;  %s1342_s25 = smov 0  }
   0x8   :  { %s1344_s26 = smov 0   ;;  %s1346_s27 = smov 0  }
   0x9 LB: > { %s1361_s28 = sadd.s32 4294967295, %s1289_s27   ;;  %s799_s29 = sadd.s32 4294967294, %s1289_s27   ;;  %s1289_s27 = sphi %s1346_s27, %s1607_s27   ;;  %s1285_s26 = sphi %s1344_s26, %s1606_s26   ;;  %s1281_s25 = sphi %s1342_s25, %s1605_s25   ;;  %s1277_s24 = sphi %s1340_s24, %s1604_s24  }
   0xa   : > { %p45_p0 = scmp.ne.s32.totalorder %s1281_s25, %s1277_s24  ;;  %p1579_p1 = scmp.eq.s32.totalorder %s1361_s28, 0 }
   0xb   : > { %p195_p2 = scmp.eq.s32.totalorder %s1361_s28, 1  ;;  %p201_p3 = scmp.eq.s32.totalorder %s799_s29, 1 }
   0xc   : > { %p1370_p4 = por %p1579_p1, %p45_p0  ;;  %p800_p5 = scmp.ge.s32.totalorder %s1289_s27, 1 }
   0xd   : > { %p1375_p6 = por %p201_p3, %p45_p0  ;;  %p208_p7 = scmp.lt.s32.totalorder %s1289_s27, 3 }
   0xe   : > { %s1586_s30 = scalar_select %p1370_p4, 1, 0 }
   0xf   : > { %s1587_s8 = scalar_select %p1375_p6, 1, 0 }
  0x10   : > { %p1380_p8 = pnand %p800_p5, %p208_p7  ;;  %s1291_s10 = smov [#allocation5]  }
  0x11   : > { %s220_s11 = sshll.u32 %s1291_s10, 4  ;;  %s1292_s13 = smov [#allocation7]   ;;  %s221_s11 = int_to_ptr.vmem [resolvable:$true] %s220_s11 }
  0x12   : > { %s1588_s9 = scalar_select %p1380_p8, 1, 0 }
  0x13   : > { %p1046_p9 = pneg %p1380_p8  ;;  %s236_s14 = sshll.u32 %s1292_s13, 4  ;;  %s237_s14 = int_to_ptr.vmem [resolvable:$true] %s236_s14 }
  0x14   : > { %s1293_s15 = smov [#allocation8]   ;;  %s1122_s17 = scalar_lea.vmem %s221_s11, 2048 }
  0x15   : > { %p1389_p11 = pnand %p1046_p9, %p1579_p1  ;;  %s252_s16 = sshll.u32 %s1293_s15, 4  ;;  %s253_s16 = int_to_ptr.vmem [resolvable:$true] %s252_s16 }
  0x16   : > { %p1123_p13 = scmp.ne.s32.totalorder %s221_s11, %s1122_s17  ;;  %p1130_p5 = scmp.lt.s32.totalorder %s221_s11, %s221_s11 }
  0x17   : > { %p1113_p12 = pneg %p1389_p11  ;;  %p1131_p7 = scmp.lt.s32.totalorder %s1122_s17, %s1122_s17 }
  0x19   : > { %p1125_p0 = pnand %p1123_p13, %p1113_p12  ;;  %p1132_p9 = por %p1131_p7, %p1130_p5 }
  0x1b   : > { %p1126_p3 = pneg %p1125_p0 }
  0x1d   : > { %p1133_p10 = pnand %p1132_p9, %p1126_p3 }
  0x1f   : > { %1136 = shalt.err (!%p1133_p10)
}
  0x20   : > { %s1580_s18 = smov 128   ;;  %s1581_s19 = smov 8  }
  0x21   : > { %s1590_s1 = sld [smem:[#allocation15_spill]]  ;;  %s1148_s22 = scalar_lea.vmem %s237_s14, 2048 }
  0x22   : > { %p1149_p13 = scmp.ne.s32.totalorder %s237_s14, %s1148_s22  ;;  %p1156_p3 = scmp.lt.s32.totalorder %s237_s14, %s237_s14 }
  0x23   : > { %p1157_p10 = scmp.lt.s32.totalorder %s1148_s22, %s1148_s22 }
  0x24   : > { %p1151_p0 = pnand %p1149_p13, %p1113_p12 }
  0x25   : > { %p1158_p7 = por %p1157_p10, %p1156_p3 }
  0x26   : > { %p1152_p5 = pneg %p1151_p0 }
  0x27   : > { %1049 = dma.hbm_to_vmem [thread:$0]  (!%p1389_p11), %s1590_s1, 2048, %s221_s11, [#allocation6], %s1580_s18, %s1580_s18, %s1581_s19  }
  0x28   : > { %p1159_p9 = pnand %p1158_p7, %p1152_p5 }
  0x2a   : > { %1162 = shalt.err (!%p1159_p9)
}
  0x2b   : > { %1052 = dma.hbm_to_vmem [thread:$0]  (!%p1389_p11), %s1574_s3, 2048, %s237_s14, [#allocation6], %s1580_s18, %s1580_s18, %s1581_s19  }
  0x2c   : > { %s1174_s10 = scalar_lea.vmem %s253_s16, 2048  ;;  %p1182_p3 = scmp.lt.s32.totalorder %s253_s16, %s253_s16 }
  0x2d   : > { %p1175_p1 = scmp.ne.s32.totalorder %s253_s16, %s1174_s10  ;;  %p1183_p5 = scmp.lt.s32.totalorder %s1174_s10, %s1174_s10 }
  0x2f   : > { %p1177_p13 = pnand %p1175_p1, %p1113_p12  ;;  %p1184_p10 = por %p1183_p5, %p1182_p3 }
  0x31   : > { %p1178_p0 = pneg %p1177_p13 }
  0x33   : > { %p1185_p7 = pnand %p1184_p10, %p1178_p0 }
  0x35   : > { %1188 = shalt.err (!%p1185_p7)
}
  0x36   : > { %1055 = dma.hbm_to_vmem [thread:$0]  (!%p1389_p11), %s1576_s5, 2048, %s253_s16, [#allocation9], %s1580_s18, %s1580_s18, %s1581_s19  }
  0x37   : > { %s1429_s14 = sadd.s32 1, %s1289_s27   ;;  %s32_s15 = sadd.s32 1, %s1285_s26 }
  0x38   : > { %s29_s12 = ssub.s32 %s1289_s27, %s1429_s14  ;;  %p39_p12 = scmp.ne.s32.totalorder %s1285_s26, %s1281_s25 }
  0x39   : > { %p30_p1 = scmp.eq.s32.totalorder %s29_s12, 0  ;;  %p40_p9 = scmp.eq.s32.totalorder %s1289_s27, 0 }
  0x3a   : > { %p1067_p13 = scmp.lt.s32.totalorder %s1289_s27, 2  ;;  %p1443_p3 = por %p195_p2, %p39_p12 }
  0x3b   : > { %s1439_s17 = scalar_select %p30_p1, %s1285_s26, %s32_s15  }
  0x3c   : > { %p41_p0 = por %p40_p9, %p39_p12  ;;  %s269_s21 = sand.u32 1, %s1285_s26  }
  0x3d   : > { %s1591_s20 = scalar_select %p1443_p3, 1, 0 }
  0x3e   : > { %s822_s22 = sshll.u32 %s1289_s27, 9  ;;  %s805_s16 = sshll.u32 %s269_s21, 5 }
  0x3f   : > { %s1452_s10 = scalar_lea.hbm %s1571_s0, %s822_s22  ;;  %s273_s11 = scalar_lea.vmem [#allocation2], %s805_s16 }
  0x40   : > { %s280_s13 = sshll.u32 %s273_s11, 4  ;;  %p1454_p11 = pnand %p1067_p13, %p41_p0  ;;  %s1458_s13 = int_to_ptr.vmem [resolvable:$true] %s280_s13 }
  0x41   : > { %s1460_s15 = scalar_lea.sflag [#allocation3], %s269_s21  ;;  %s1189_s18 = scalar_lea.hbm %s1452_s10, 512 }
  0x42   : > { %p1190_p2 = scmp.ne.s32.totalorder %s1452_s10, %s1189_s18  ;;  %p1191_p5 = pneg %p1454_p11 }
  0x43   : > { %s1194_s16 = scalar_lea.hbm %s1571_s0, 1024  ;;  %p1195_p1 = scmp.lt.s32.totalorder %s1452_s10, %s1571_s0 }
  0x44   : > { %p1192_p10 = pnand %p1191_p5, %p1190_p2  ;;  %p1196_p12 = scmp.lt.s32.totalorder %s1194_s16, %s1189_s18 }
  0x46   : > { %p1193_p7 = pneg %p1192_p10  ;;  %p1197_p9 = por %p1196_p12, %p1195_p1 }
  0x48   : > { %p1198_p13 = pnand %p1197_p9, %p1193_p7 }
  0x4a   : > { %1201 = shalt.err (!%p1198_p13)
}
  0x4b   : > { %s1202_s21 = scalar_lea.vmem %s1458_s13, 512  ;;  %s1296_s19 = smov [#allocation2]  }
  0x4c   : > { %p1203_p0 = scmp.ne.s32.totalorder %s1458_s13, %s1202_s21  ;;  %s1207_s1 = sshll.u32 %s1296_s19, 4  ;;  %s1208_s1 = int_to_ptr.vmem [resolvable:$false] %s1207_s1 }
  0x4d   : > { %s1209_s22 = scalar_lea.vmem %s1208_s1, 1024  ;;  %p1210_p10 = scmp.lt.s32.totalorder %s1458_s13, %s1208_s1 }
  0x4e   : > { %p1205_p6 = pnand %p1203_p0, %p1191_p5  ;;  %p1211_p3 = scmp.lt.s32.totalorder %s1209_s22, %s1202_s21 }
  0x50   : > { %p1206_p2 = pneg %p1205_p6  ;;  %p1212_p4 = por %p1211_p3, %p1210_p10 }
  0x52   : > { %p1213_p8 = pnand %p1212_p4, %p1206_p2 }
  0x54   : > { %1216 = shalt.err (!%p1213_p8)
}
  0x55   : > { %s1593_s18 = smov 8   ;;  %s1594_s23 = smov 128  }
  0x56   : > { %1059 = dma.hbm_to_vmem [thread:$0]  (!%p1454_p11), %s1452_s10, 512, %s1458_s13, %s1460_s15, %s1594_s23, %s1594_s23, %s1593_s18  }
  0x57   : > { %p1595_p6 = scmp.ne.s32.totalorder %s1588_s9, 0 }
  0x58   : > { %s1487_s19 = sand.u32 (!%p1595_p6), 1, %s1281_s25   ;;  %p1596_p4 = scmp.ne.s32.totalorder (!%p1595_p6), %s1586_s30, 0 }
  0x59   : > { %292 = sbr.rel (%p1595_p6) target bundleno = 750 (0x2ee), region = 48  ;;  %s809_s1 = sshll.u32 (!%p1595_p6), %s1487_s19, 5 }
  0x5a   : > { %s295_s16 = scalar_lea.sflag (!%p1595_p6), [#allocation3], %s1487_s19  ;;  %s1493_s12 = scalar_lea.vmem (!%p1595_p6), [#allocation2], %s809_s1 }
  0x5e   : > { %1260 = dma.done.wait (%p1596_p4), %s295_s16, 512  }
  0x5f   : > { %1262 = vsyncadd (%p1596_p4), %s295_s16, 4294966784  ;;  %p1597_p8 = scmp.eq.s32.totalorder %s1361_s28, 0 }
  0x61   : > { %1264 = dma.done.wait (%p1597_p8), [#allocation6], 4096   ;;  %p1598_p3 = pmov %p1597_p8 }
  0x63   : > { %1266 = vsyncadd (%p1598_p3), [#allocation6], 4294963200  ;;  %p1599_p11 = pmov %p1598_p3 }
  0x64   : > { %p1600_p5 = pmov %p1598_p3 }
  0x65   : > { %1268 = dma.done.wait (%p1599_p11), [#allocation9], 2048  }
  0x66   : > { %1270 = vsyncadd (%p1600_p5), [#allocation9], 4294965248  ;;  %v362_v0 = vld [vmem:[#allocation5 + $0x78] sm:$0xff]  ;;  %v361_v1 = vld [vmem:[#allocation5 + $0x70] sm:$0xff]  ;;  %s340_s11 = scalar_lea.vmem [#allocation10], %s809_s1  ;;  %s823_s22 = sshll.u32 %s1361_s28, 9 }
  0x67   : > { %884 = vmatprep.subr.mxu0 %v362_v0  ;;  %v360_v2 = vld [vmem:[#allocation5 + $0x68] sm:$0xff]  ;;  %v359_v3 = vld [vmem:[#allocation5 + $0x60] sm:$0xff]  ;;  %v358_v5 = vld [vmem:[#allocation5 + $0x58] sm:$0xff]  ;;  %s697_s21 = sshll.u32 %s340_s11, 4  ;;  %s1528_s16 = scalar_lea.hbm %s1578_s7, %s823_s22  ;;  %s1523_s21 = int_to_ptr.vmem [resolvable:$true] %s697_s21 }
  0x68   : > { %885 = vmatpush3.msra.mxu0 %v362_v0  ;;  %v343_v4 = vld [vmem:[%s1493_s12] sm:$0xff]  ;;  %v474_v6 = vld [vmem:[#allocation7 + $0x78] sm:$0xff]  ;;  %v473_v7 = vld [vmem:[#allocation7 + $0x70] sm:$0xff]  ;;  %s684_s1 = scalar_lea.sflag [#allocation4], %s1487_s19  ;;  %p1601_p1 = scmp.ne.s32.totalorder %s1591_s20, 0 }
  0x69   : > { %886 = vmatprep.subr.mxu0 %v361_v1  ;;  %916 = vmatprep.mubr.f32.mxu0 %v343_v4  ;;  %v357_v8 = vld [vmem:[#allocation5 + $0x50] sm:$0xff]  ;;  %v472_v9 = vld [vmem:[#allocation7 + $0x68] sm:$0xff]  ;;  %v471_v11 = vld [vmem:[#allocation7 + $0x60] sm:$0xff]  ;;  %s1297_s28 = smov [#allocation10]  }
  0x6a   : > { %887 = vmatpush3.msra.mxu0 %v361_v1  ;;  %922 = vmatprep.subr.mxu1 %v474_v6  ;;  %v356_v10 = vld [vmem:[#allocation5 + $0x48] sm:$0xff]  ;;  %v355_v12 = vld [vmem:[#allocation5 + $0x40] sm:$0xff]  ;;  %v470_v13 = vld [vmem:[#allocation7 + $0x58] sm:$0xff]  ;;  %s1221_s30 = sshll.u32 %s1297_s28, 4  ;;  %s1222_s30 = int_to_ptr.vmem [resolvable:$false] %s1221_s30 }
  0x6b   : > { %888 = vmatprep.subr.mxu0 %v360_v2  ;;  %923 = vmatpush3.msra.mxu1 %v474_v6  ;;  %v354_v14 = vld [vmem:[#allocation5 + $0x38] sm:$0xff]  ;;  %v469_v15 = vld [vmem:[#allocation7 + $0x50] sm:$0xff]  ;;  %v468_v17 = vld [vmem:[#allocation7 + $0x48] sm:$0xff]  ;;  %s1223_s9 = scalar_lea.vmem %s1222_s30, 1024  ;;  %p1224_p13 = scmp.lt.s32.totalorder %s1523_s21, %s1222_s30 }
  0x6c   : > { %889 = vmatpush3.msra.mxu0 %v360_v2  ;;  %924 = vmatprep.subr.mxu1 %v473_v7  ;;  %v353_v16 = vld [vmem:[#allocation5 + $0x30] sm:$0xff]  ;;  %v352_v18 = vld [vmem:[#allocation5 + $0x28] sm:$0xff]  ;;  %v467_v19 = vld [vmem:[#allocation7 + $0x40] sm:$0xff] }
  0x6d   : > { %890 = vmatprep.subr.mxu0 %v359_v3  ;;  %925 = vmatpush3.msra.mxu1 %v473_v7  ;;  %v351_v20 = vld [vmem:[#allocation5 + $0x20] sm:$0xff]  ;;  %v466_v21 = vld [vmem:[#allocation7 + $0x38] sm:$0xff]  ;;  %v465_v23 = vld [vmem:[#allocation7 + $0x30] sm:$0xff] }
  0x6e   : > { %891 = vmatpush3.msra.mxu0 %v359_v3  ;;  %926 = vmatprep.subr.mxu1 %v472_v9  ;;  %v350_v22 = vld [vmem:[#allocation5 + $0x18] sm:$0xff]  ;;  %v349_v24 = vld [vmem:[#allocation5 + $0x10] sm:$0xff]  ;;  %v464_v25 = vld [vmem:[#allocation7 + $0x28] sm:$0xff] }
  0x6f   : > { %892 = vmatprep.subr.mxu0 %v358_v5  ;;  %927 = vmatpush3.msra.mxu1 %v472_v9  ;;  %v348_v26 = vld [vmem:[#allocation5 + $0x8] sm:$0xff]  ;;  %v463_v27 = vld [vmem:[#allocation7 + $0x20] sm:$0xff]  ;;  %v345_v30 = vld [vmem:[%s1493_s12 + $0x10] sm:$0xff] }
  0x70   : > { %893 = vmatpush3.msra.mxu0 %v358_v5  ;;  %928 = vmatprep.subr.mxu1 %v471_v11  ;;  %v347_v28 = vld [vmem:[#allocation5] sm:$0xff]  ;;  %v344_v29 = vld [vmem:[%s1493_s12 + $0x8] sm:$0xff]  ;;  %v346_v31 = vld [vmem:[%s1493_s12 + $0x18] sm:$0xff]  ;;  %s1217_s12 = scalar_lea.vmem %s1523_s21, 512 }
  0x71   : > { %894 = vmatprep.subr.mxu0 %v357_v8  ;;  %929 = vmatpush3.msra.mxu1 %v471_v11  ;;  %v462_v32 = vld [vmem:[#allocation7 + $0x18] sm:$0xff]  ;;  %v461_v33 = vld [vmem:[#allocation7 + $0x10] sm:$0xff]  ;;  %v460_v34 = vld [vmem:[#allocation7 + $0x8] sm:$0xff]  ;;  %p1218_p7 = scmp.ne.s32.totalorder %s1523_s21, %s1217_s12  ;;  %p1225_p0 = scmp.lt.s32.totalorder %s1223_s9, %s1217_s12 }
  0x72   : > { %895 = vmatpush3.msra.mxu0 %v357_v8  ;;  %930 = vmatprep.subr.mxu1 %v470_v13  ;;  %v459_v35 = vld [vmem:[#allocation7] sm:$0xff]  ;;  %v586_v36 = vld [vmem:[#allocation8 + $0x78] sm:$0xff]  ;;  %v585_v37 = vld [vmem:[#allocation8 + $0x70] sm:$0xff] }
  0x73   : > { %896 = vmatprep.subr.mxu0 %v356_v10  ;;  %931 = vmatpush3.msra.mxu1 %v470_v13  ;;  %v584_v38 = vld [vmem:[#allocation8 + $0x68] sm:$0xff]  ;;  %v583_v39 = vld [vmem:[#allocation8 + $0x60] sm:$0xff]  ;;  %v582_v40 = vld [vmem:[#allocation8 + $0x58] sm:$0xff]  ;;  %p1219_p12 = pnand %p1218_p7, %p1601_p1  ;;  %p1226_p2 = por %p1225_p0, %p1224_p13 }
  0x74   : > { %897 = vmatpush3.msra.mxu0 %v356_v10  ;;  %932 = vmatprep.subr.mxu1 %v469_v15  ;;  %v581_v41 = vld [vmem:[#allocation8 + $0x50] sm:$0xff]  ;;  %v580_v42 = vld [vmem:[#allocation8 + $0x48] sm:$0xff]  ;;  %v579_v43 = vld [vmem:[#allocation8 + $0x40] sm:$0xff] }
  0x75   : > { %898 = vmatprep.subr.mxu0 %v355_v12  ;;  %933 = vmatpush3.msra.mxu1 %v469_v15  ;;  %v578_v44 = vld [vmem:[#allocation8 + $0x38] sm:$0xff]  ;;  %v577_v45 = vld [vmem:[#allocation8 + $0x30] sm:$0xff]  ;;  %v576_v46 = vld [vmem:[#allocation8 + $0x28] sm:$0xff]  ;;  %p1220_p9 = pneg %p1219_p12 }
  0x76   : > { %899 = vmatpush3.msra.mxu0 %v355_v12  ;;  %934 = vmatprep.subr.mxu1 %v468_v17  ;;  %v575_v47 = vld [vmem:[#allocation8 + $0x20] sm:$0xff]  ;;  %v574_v61 = vld [vmem:[#allocation8 + $0x18] sm:$0xff]  ;;  %v573_v62 = vld [vmem:[#allocation8 + $0x10] sm:$0xff] }
  0x77   : > { %900 = vmatprep.subr.mxu0 %v354_v14  ;;  %935 = vmatpush3.msra.mxu1 %v468_v17  ;;  %v814_v48 = vld [vmem:[%s1573_s2] ss:$0 sm:$0xff]  ;;  %v572_v63 = vld [vmem:[#allocation8 + $0x8] sm:$0xff]  ;;  %p1227_p10 = pnand %p1226_p2, %p1220_p9 }
  0x78   : > { %901 = vmatpush3.msra.mxu0 %v354_v14  ;;  %936 = vmatprep.subr.mxu1 %v467_v19  ;;  %v571_v0 = vld [vmem:[#allocation8] sm:$0xff] }
  0x79   : > { %902 = vmatprep.subr.mxu0 %v353_v16  ;;  %937 = vmatpush3.msra.mxu1 %v467_v19  ;;  %v815_v1 = vld [vmem:[%s1575_s4] ss:$0 sm:$0xff] }
  0x7a   : > { %903 = vmatpush3.msra.mxu0 %v353_v16  ;;  %938 = vmatprep.subr.mxu1 %v466_v21  ;;  %v816_v14 = vld [vmem:[%s1577_s6] ss:$0 sm:$0xff] }
  0x7b   : > { %904 = vmatprep.subr.mxu0 %v352_v18  ;;  %939 = vmatpush3.msra.mxu1 %v466_v21 }
  0x7c   : > { %905 = vmatpush3.msra.mxu0 %v352_v18  ;;  %940 = vmatprep.subr.mxu1 %v465_v23 }
  0x7d   : > { %906 = vmatprep.subr.mxu0 %v351_v20  ;;  %941 = vmatpush3.msra.mxu1 %v465_v23 }
  0x7e   : > { %907 = vmatpush3.msra.mxu0 %v351_v20  ;;  %942 = vmatprep.subr.mxu1 %v464_v25 }
  0x7f   : > { %908 = vmatprep.subr.mxu0 %v350_v22  ;;  %943 = vmatpush3.msra.mxu1 %v464_v25 }
  0x80   : > { %909 = vmatpush3.msra.mxu0 %v350_v22  ;;  %944 = vmatprep.subr.mxu1 %v463_v27 }
  0x81   : > { %910 = vmatprep.subr.mxu0 %v349_v24  ;;  %945 = vmatpush3.msra.mxu1 %v463_v27 }
  0x82   : > { %911 = vmatpush3.msra.mxu0 %v349_v24  ;;  %946 = vmatprep.subr.mxu1 %v462_v32 }
  0x83   : > { %912 = vmatprep.subr.mxu0 %v348_v26  ;;  %947 = vmatpush3.msra.mxu1 %v462_v32 }
  0x84   : > { %913 = vmatpush3.msra.mxu0 %v348_v26  ;;  %948 = vmatprep.subr.mxu1 %v461_v33 }
  0x85   : > { %914 = vmatprep.subr.mxu0 %v347_v28  ;;  %949 = vmatpush3.msra.mxu1 %v461_v33 }
  0x86   : > { %915 = vmatpush3.msra.mxu0 %v347_v28  ;;  %950 = vmatprep.subr.mxu1 %v460_v34 }
  0x87   : > { %917 = vmatmul.mubr.f32.vlgmr.msra.gmra.mxu0 %v344_v29  ;;  %951 = vmatpush3.msra.mxu1 %v460_v34 }
  0x88   : > { %919 = vmatprep.mubr.f32.mxu0 %v345_v30  ;;  %952 = vmatprep.subr.mxu1 %v459_v35 }
  0x89   : > { %953 = vmatpush3.msra.mxu1 %v459_v35  ;;  %960 = vmatprep.subr.mxu0 %v586_v36 }
  0x8a   : > { %998 = vmatprep.subr.mxu1 %v586_v36  ;;  %961 = vmatpush3.msra.mxu0 %v586_v36 }
  0x8b   : > { %920 = vmatmul.mubr.f32.gmra.mxu0 %v346_v31  ;;  %962 = vmatprep.subr.mxu0 %v585_v37 }
  0x8c   : > { %963 = vmatpush3.msra.mxu0 %v585_v37 }
  0x8d   : > { %964 = vmatprep.subr.mxu0 %v584_v38 }
  0x8e   : > { %965 = vmatpush3.msra.mxu0 %v584_v38 }
  0x8f   : > { %966 = vmatprep.subr.mxu0 %v583_v39 }
  0x90   : > { %967 = vmatpush3.msra.mxu0 %v583_v39 }
  0x91   : > { %968 = vmatprep.subr.mxu0 %v582_v40 }
  0x92   : > { %969 = vmatpush3.msra.mxu0 %v582_v40 }
  0x93   : > { %970 = vmatprep.subr.mxu0 %v581_v41 }
  0x94   : > { %971 = vmatpush3.msra.mxu0 %v581_v41 }
  0x95   : > { %972 = vmatprep.subr.mxu0 %v580_v42 }
  0x96   : > { %973 = vmatpush3.msra.mxu0 %v580_v42 }
  0x97   : > { %974 = vmatprep.subr.mxu0 %v579_v43 }
  0x98   : > { %975 = vmatpush3.msra.mxu0 %v579_v43 }
  0x99   : > { %976 = vmatprep.subr.mxu0 %v578_v44 }
  0x9a   : > { %977 = vmatpush3.msra.mxu0 %v578_v44 }
  0x9b   : > { %978 = vmatprep.subr.mxu0 %v577_v45 }
  0x9c   : > { %979 = vmatpush3.msra.mxu0 %v577_v45 }
  0x9d   : > { %980 = vmatprep.subr.mxu0 %v576_v46 }
  0x9e   : > { %981 = vmatpush3.msra.mxu0 %v576_v46 }
  0x9f   : > { %982 = vmatprep.subr.mxu0 %v575_v47 }
  0xa0   : > { %983 = vmatpush3.msra.mxu0 %v575_v47 }
  0xa1   : > { %984 = vmatprep.subr.mxu0 %v574_v61 }
  0xa2   : > { %985 = vmatpush3.msra.mxu0 %v574_v61 }
  0xa3   : > { %986 = vmatprep.subr.mxu0 %v573_v62 }
  0xa4   : > { %987 = vmatpush3.msra.mxu0 %v573_v62 }
  0xa5   : > { %988 = vmatprep.subr.mxu0 %v572_v63 }
  0xa6   : > { %989 = vmatpush3.msra.mxu0 %v572_v63 }
  0xa7   : > { %990 = vmatprep.subr.mxu0 %v571_v0 }
  0xa8   : > { %991 = vmatpush3.msra.mxu0 %v571_v0 }
 0x147   : > { %v918_v49 = vpop.f32.mrf.mxu0 }
 0x148   : > { %v442_v50 = vadd.f32 %v918_v49, %v814_v48 }
 0x149   : > { %v436_v51 = vpop.f32.mrf.mxu0 }
 0x14a   : > { %v437_v52 = vadd.f32 %v814_v48, %v436_v51  ;;  %v456_v55 = vmax.f32 %v442_v50, 0.0 }
 0x14b   : > { %v921_v53 = vpop.f32.mrf.mxu0 }
 0x14c   : > { %v455_v54 = vmax.f32 %v437_v52, 0.0  ;;  %v452_v56 = vadd.f32 %v921_v53, %v814_v48 }
 0x14d   : > { %v446_v57 = vpop.f32.mrf.mxu0 }
 0x14e   : > { %v447_v58 = vadd.f32 %v814_v48, %v446_v57  ;;  %954 = vmatprep.mubr.f32.mxu1 %v455_v54  ;;  %v458_v60 = vmax.f32 %v452_v56, 0.0 }
 0x14f   : > { %955 = vmatmul.mubr.f32.vlgmr.msra.gmra.mxu1 %v456_v55 }
 0x150   : > { %v457_v59 = vmax.f32 %v447_v58, 0.0  ;;  %1014 = vmatpush3.msra.mxu1 %v586_v36 }
 0x151   : > { %999 = vmatprep.subr.mxu1 %v585_v37 }
 0x152   : > { %957 = vmatprep.mubr.f32.mxu1 %v457_v59  ;;  %1015 = vmatpush3.msra.mxu1 %v585_v37 }
 0x153   : > { %958 = vmatmul.mubr.f32.gmra.mxu1 %v458_v60  ;;  %1000 = vmatprep.subr.mxu1 %v584_v38 }
 0x154   : > { %1016 = vmatpush3.msra.mxu1 %v584_v38 }
 0x155   : > { %1001 = vmatprep.subr.mxu1 %v583_v39 }
 0x156   : > { %1017 = vmatpush3.msra.mxu1 %v583_v39 }
 0x157   : > { %1002 = vmatprep.subr.mxu1 %v582_v40 }
 0x158   : > { %1018 = vmatpush3.msra.mxu1 %v582_v40 }
 0x159   : > { %1003 = vmatprep.subr.mxu1 %v581_v41 }
 0x15a   : > { %1019 = vmatpush3.msra.mxu1 %v581_v41 }
 0x15b   : > { %1004 = vmatprep.subr.mxu1 %v580_v42 }
 0x15c   : > { %1020 = vmatpush3.msra.mxu1 %v580_v42 }
 0x15d   : > { %1005 = vmatprep.subr.mxu1 %v579_v43 }
 0x15e   : > { %1021 = vmatpush3.msra.mxu1 %v579_v43 }
 0x15f   : > { %1006 = vmatprep.subr.mxu1 %v578_v44 }
 0x160   : > { %1022 = vmatpush3.msra.mxu1 %v578_v44 }
 0x161   : > { %1007 = vmatprep.subr.mxu1 %v577_v45 }
 0x162   : > { %1023 = vmatpush3.msra.mxu1 %v577_v45 }
 0x163   : > { %1008 = vmatprep.subr.mxu1 %v576_v46 }
 0x164   : > { %1024 = vmatpush3.msra.mxu1 %v576_v46 }
 0x165   : > { %1009 = vmatprep.subr.mxu1 %v575_v47 }
 0x166   : > { %1025 = vmatpush3.msra.mxu1 %v575_v47 }
 0x167   : > { %1010 = vmatprep.subr.mxu1 %v574_v61 }
 0x168   : > { %1026 = vmatpush3.msra.mxu1 %v574_v61 }
 0x169   : > { %1011 = vmatprep.subr.mxu1 %v573_v62 }
 0x16a   : > { %1027 = vmatpush3.msra.mxu1 %v573_v62 }
 0x16b   : > { %1012 = vmatprep.subr.mxu1 %v572_v63 }
 0x16c   : > { %1028 = vmatpush3.msra.mxu1 %v572_v63 }
 0x16d   : > { %1013 = vmatprep.subr.mxu1 %v571_v0 }
 0x16e   : > { %1029 = vmatpush3.msra.mxu1 %v571_v0 }
 0x20f   : > { %v956_v2 = vpop.f32.mrf.mxu1 }
 0x210   : > { %v554_v3 = vadd.f32 %v956_v2, %v815_v1 }
 0x211   : > { %v548_v4 = vpop.f32.mrf.mxu1 }
 0x212   : > { %v549_v5 = vadd.f32 %v815_v1, %v548_v4  ;;  %v568_v8 = vmax.f32 %v554_v3, 0.0 }
 0x213   : > { %v959_v6 = vpop.f32.mrf.mxu1 }
 0x214   : > { %v567_v7 = vmax.f32 %v549_v5, 0.0  ;;  %v564_v9 = vadd.f32 %v959_v6, %v815_v1 }
 0x215   : > { %v558_v10 = vpop.f32.mrf.mxu1 }
 0x216   : > { %v559_v11 = vadd.f32 %v815_v1, %v558_v10  ;;  %992 = vmatprep.mubr.f32.mxu0 %v567_v7  ;;  %v570_v13 = vmax.f32 %v564_v9, 0.0 }
 0x217   : > { %993 = vmatmul.mubr.f32.vlgmr.msra.gmra.mxu0 %v568_v8 }
 0x218   : > { %v569_v12 = vmax.f32 %v559_v11, 0.0 }
 0x21a   : > { %995 = vmatprep.mubr.f32.mxu1 %v569_v12 }
 0x21b   : > { %996 = vmatmul.mubr.f32.vlgmr.msra.gmra.mxu1 %v570_v13 }
 0x2d7   : > { %v994_v15 = vpop.f32.mrf.mxu0 }
 0x2d8   : > { %v666_v16 = vadd.f32 %v994_v15, %v816_v14 }
 0x2d9   : > { %v660_v17 = vpop.f32.mrf.mxu0 }
 0x2da   : > { %680 = vst [vmem:[%s340_s11 + $0x8] sm:$0xff] %v666_v16  ;;  %v661_v18 = vadd.f32 %v816_v14, %v660_v17 }
 0x2db   : > { %v997_v19 = vpop.f32.mrf.mxu1 }
 0x2dc   : > { %679 = vst [vmem:[%s340_s11] sm:$0xff] %v661_v18  ;;  %v676_v20 = vadd.f32 %v997_v19, %v816_v14 }
 0x2dd   : > { %v670_v21 = vpop.f32.mrf.mxu1 }
 0x2de   : > { %682 = vst [vmem:[%s340_s11 + $0x18] sm:$0xff] %v676_v20  ;;  %v671_v22 = vadd.f32 %v816_v14, %v670_v21 }
 0x2e0   : > { %681 = vst [vmem:[%s340_s11 + $0x10] sm:$0xff] %v671_v22 }
 0x2e1   : > { %1230 = shalt.err (!%p1227_p10)
}
 0x2e2   : > { %s1231_s10 = scalar_lea.hbm %s1528_s16, 512  ;;  %s1235_s29 = scalar_lea.hbm %s1578_s7, 1024 }
 0x2e3   : > { %p1232_p6 = scmp.ne.s32.totalorder %s1528_s16, %s1231_s10  ;;  %p1236_p3 = scmp.lt.s32.totalorder %s1528_s16, %s1578_s7 }
 0x2e4   : > { %p1237_p11 = scmp.lt.s32.totalorder %s1235_s29, %s1231_s10 }
 0x2e5   : > { %p1233_p4 = pnand %p1232_p6, %p1601_p1 }
 0x2e6   : > { %p1238_p5 = por %p1237_p11, %p1236_p3 }
 0x2e7   : > { %p1234_p8 = pneg %p1233_p4 }
 0x2e9   : > { %p1239_p7 = pnand %p1238_p5, %p1234_p8 }
 0x2eb   : > { %1242 = shalt.err (!%p1239_p7)
}
 0x2ec   : > { %s1298_s18 = smov 128   ;;  %s1299_s23 = smov 8  }
 0x2ed   : > { %1044 = dma.vmem_to_hbm [thread:$0]  (%p1601_p1), %s1523_s21, 512, %s1528_s16, %s684_s1, %s1298_s18, %s1298_s18, %s1299_s23  }
 0x2ee PF: > { %s712_s12 = sand.u32 1, %s1277_s24   ;;  %p1602_p12 = scmp.ne.s32.totalorder %s1587_s8, 0 }
 0x2ef   : > { %p1603_p9 = scmp.ge.s32.totalorder %s1289_s27, 2  ;;  %s713_s28 = scalar_lea.sflag [#allocation4], %s712_s12 }
 0x2f1   : > { %p1061_p13 = pnand %p1603_p9, %p1602_p12 }
 0x2f3   : > { %p1062_p0 = pneg %p1061_p13 }
 0x2f5   : > { %1272 = dma.done.wait (%p1062_p0), %s713_s28, 512  }
 0x2f6   : > { %1274 = vsyncadd (%p1062_p0), %s713_s28, 4294966784  ;;  %p22_p2 = scmp.ge.s32.totalorder %s1429_s14, 4   ;;  %s1604_s24 = smov %s1281_s25 }
 0x2f7   : > { %s1605_s25 = smov %s1285_s26  ;;  %s1606_s26 = smov %s1439_s17 }
 0x2f8   : > { %s1607_s27 = smov %s1429_s14  ;;  %24 = sbr.rel (!%p22_p2) target bundleno = 9 (0x9), region = 105 }
 0x2fd   :  { %718 = vsyncpa [#allocation3], 1 }
 0x2fe   :  { %720 = vsyncpa [#allocation3 + $0x1], 1 }
 0x2ff   :  { %721 = vsyncpa [#allocation6], 1 }
 0x300   :  { %722 = vsyncpa [#allocation9], 1 }
 0x301   :  { %723 = vsyncpa [#allocation4], 1 }
 0x302   :  { %725 = vsyncpa [#allocation4 + $0x1], 1 }

// kernel: tpu_custom_call.1
= control target key start
LH: loop header
LB: loop body
LE: loop exit
PB: predicated region body
PF: predicated region fallthrough
CT: control target
= control target key end

     0   :  { %s1571_s0 = inlined_call_operand.hbm [shape: f32[64,128], index: 0, kind: input, shape index: {}]   ;;  %s1572_s1 = inlined_call_operand.hbm [shape: f32[128,128], index: 1, kind: input, shape index: {}]   ;;  %s1573_s2 = inlined_call_operand.vmem [shape: f32[1,128], index: 2, kind: input, shape index: {}]   ;;  %s1574_s3 = inlined_call_operand.hbm [shape: f32[128,128], index: 3, kind: input, shape index: {}]   ;;  %s1575_s4 = inlined_call_operand.vmem [shape: f32[1,128], index: 4, kind: input, shape index: {}]   ;;  %s1576_s5 = inlined_call_operand.hbm [shape: f32[128,128], index: 5, kind: input, shape index: {}]   ;;  %s1577_s6 = inlined_call_operand.vmem [shape: f32[1,128], index: 6, kind: input, shape index: {}]   ;;  %s1578_s7 = inlined_call_operand.hbm [shape: f32[64,128], index: 7, kind: output, shape index: {}]  }
   0x1   :  { %1585 = sst [smem:[#allocation15_spill]] %s1572_s1 }
   0x2   :  { %12 = vsyncpa [#allocation3], 0 }
   0x3   :  { %14 = vsyncpa [#allocation3 + $0x1], 0 }
   0x4   :  { %15 = vsyncpa [#allocation6], 0 }
   0x5   :  { %16 = vsyncpa [#allocation9], 0 }
   0x6   :  { %17 = vsyncpa [#allocation4], 0 }
   0x7   :  { %19 = vsyncpa [#allocation4 + $0x1], 0  ;;  %s1340_s24 = smov 0   ;;  %s1342_s25 = smov 0  }
   0x8   :  { %s1344_s26 = smov 0   ;;  %s1346_s27 = smov 0  }
   0x9 LB: > { %s1361_s28 = sadd.s32 4294967295, %s1289_s27   ;;  %s799_s29 = sadd.s32 4294967294, %s1289_s27   ;;  %s1289_s27 = sphi %s1346_s27, %s1607_s27   ;;  %s1285_s26 = sphi %s1344_s26, %s1606_s26   ;;  %s1281_s25 = sphi %s1342_s25, %s1605_s25   ;;  %s1277_s24 = sphi %s1340_s24, %s1604_s24  }
   0xa   : > { %p45_p0 = scmp.ne.s32.totalorder %s1281_s25, %s1277_s24  ;;  %p1579_p1 = scmp.eq.s32.totalorder %s1361_s28, 0 }
   0xb   : > { %p195_p2 = scmp.eq.s32.totalorder %s1361_s28, 1  ;;  %p201_p3 = scmp.eq.s32.totalorder %s799_s29, 1 }
   0xc   : > { %p1370_p4 = por %p1579_p1, %p45_p0  ;;  %p800_p5 = scmp.ge.s32.totalorder %s1289_s27, 1 }
   0xd   : > { %p1375_p6 = por %p201_p3, %p45_p0  ;;  %p208_p7 = scmp.lt.s32.totalorder %s1289_s27, 3 }
   0xe   : > { %s1586_s30 = scalar_select %p1370_p4, 1, 0 }
   0xf   : > { %s1587_s8 = scalar_select %p1375_p6, 1, 0 }
  0x10   : > { %p1380_p8 = pnand %p800_p5, %p208_p7  ;;  %s1291_s10 = smov [#allocation5]  }
  0x11   : > { %s220_s11 = sshll.u32 %s1291_s10, 4  ;;  %s1292_s13 = smov [#allocation7]   ;;  %s221_s11 = int_to_ptr.vmem [resolvable:$true] %s220_s11 }
  0x12   : > { %s1588_s9 = scalar_select %p1380_p8, 1, 0 }
  0x13   : > { %p1046_p9 = pneg %p1380_p8  ;;  %s236_s14 = sshll.u32 %s1292_s13, 4  ;;  %s237_s14 = int_to_ptr.vmem [resolvable:$true] %s236_s14 }
  0x14   : > { %s1293_s15 = smov [#allocation8]   ;;  %s1122_s17 = scalar_lea.vmem %s221_s11, 2048 }
  0x15   : > { %p1389_p11 = pnand %p1046_p9, %p1579_p1  ;;  %s252_s16 = sshll.u32 %s1293_s15, 4  ;;  %s253_s16 = int_to_ptr.vmem [resolvable:$true] %s252_s16 }
  0x16   : > { %p1123_p13 = scmp.ne.s32.totalorder %s221_s11, %s1122_s17  ;;  %p1130_p5 = scmp.lt.s32.totalorder %s221_s11, %s221_s11 }
  0x17   : > { %p1113_p12 = pneg %p1389_p11  ;;  %p1131_p7 = scmp.lt.s32.totalorder %s1122_s17, %s1122_s17 }
  0x19   : > { %p1125_p0 = pnand %p1123_p13, %p1113_p12  ;;  %p1132_p9 = por %p1131_p7, %p1130_p5 }
  0x1b   : > { %p1126_p3 = pneg %p1125_p0 }
  0x1d   : > { %p1133_p10 = pnand %p1132_p9, %p1126_p3 }
  0x1f   : > { %1136 = shalt.err (!%p1133_p10)
}
  0x20   : > { %s1580_s18 = smov 128   ;;  %s1581_s19 = smov 8  }
  0x21   : > { %s1590_s1 = sld [smem:[#allocation15_spill]]  ;;  %s1148_s22 = scalar_lea.vmem %s237_s14, 2048 }
  0x22   : > { %p1149_p13 = scmp.ne.s32.totalorder %s237_s14, %s1148_s22  ;;  %p1156_p3 = scmp.lt.s32.totalorder %s237_s14, %s237_s14 }
  0x23   : > { %p1157_p10 = scmp.lt.s32.totalorder %s1148_s22, %s1148_s22 }
  0x24   : > { %p1151_p0 = pnand %p1149_p13, %p1113_p12 }
  0x25   : > { %p1158_p7 = por %p1157_p10, %p1156_p3 }
  0x26   : > { %p1152_p5 = pneg %p1151_p0 }
  0x27   : > { %1049 = dma.hbm_to_vmem [thread:$0]  (!%p1389_p11), %s1590_s1, 2048, %s221_s11, [#allocation6], %s1580_s18, %s1580_s18, %s1581_s19  }
  0x28   : > { %p1159_p9 = pnand %p1158_p7, %p1152_p5 }
  0x2a   : > { %1162 = shalt.err (!%p1159_p9)
}
  0x2b   : > { %1052 = dma.hbm_to_vmem [thread:$0]  (!%p1389_p11), %s1574_s3, 2048, %s237_s14, [#allocation6], %s1580_s18, %s1580_s18, %s1581_s19  }
  0x2c   : > { %s1174_s10 = scalar_lea.vmem %s253_s16, 2048  ;;  %p1182_p3 = scmp.lt.s32.totalorder %s253_s16, %s253_s16 }
  0x2d   : > { %p1175_p1 = scmp.ne.s32.totalorder %s253_s16, %s1174_s10  ;;  %p1183_p5 = scmp.lt.s32.totalorder %s1174_s10, %s1174_s10 }
  0x2f   : > { %p1177_p13 = pnand %p1175_p1, %p1113_p12  ;;  %p1184_p10 = por %p1183_p5, %p1182_p3 }
  0x31   : > { %p1178_p0 = pneg %p1177_p13 }
  0x33   : > { %p1185_p7 = pnand %p1184_p10, %p1178_p0 }
  0x35   : > { %1188 = shalt.err (!%p1185_p7)
}
  0x36   : > { %1055 = dma.hbm_to_vmem [thread:$0]  (!%p1389_p11), %s1576_s5, 2048, %s253_s16, [#allocation9], %s1580_s18, %s1580_s18, %s1581_s19  }
  0x37   : > { %s1429_s14 = sadd.s32 1, %s1289_s27   ;;  %s32_s15 = sadd.s32 1, %s1285_s26 }
  0x38   : > { %s29_s12 = ssub.s32 %s1289_s27, %s1429_s14  ;;  %p39_p12 = scmp.ne.s32.totalorder %s1285_s26, %s1281_s25 }
  0x39   : > { %p30_p1 = scmp.eq.s32.totalorder %s29_s12, 0  ;;  %p40_p9 = scmp.eq.s32.totalorder %s1289_s27, 0 }
  0x3a   : > { %p1067_p13 = scmp.lt.s32.totalorder %s1289_s27, 2  ;;  %p1443_p3 = por %p195_p2, %p39_p12 }
  0x3b   : > { %s1439_s17 = scalar_select %p30_p1, %s1285_s26, %s32_s15  }
  0x3c   : > { %p41_p0 = por %p40_p9, %p39_p12  ;;  %s269_s21 = sand.u32 1, %s1285_s26  }
  0x3d   : > { %s1591_s20 = scalar_select %p1443_p3, 1, 0 }
  0x3e   : > { %s822_s22 = sshll.u32 %s1289_s27, 9  ;;  %s805_s16 = sshll.u32 %s269_s21, 5 }
  0x3f   : > { %s1452_s10 = scalar_lea.hbm %s1571_s0, %s822_s22  ;;  %s273_s11 = scalar_lea.vmem [#allocation2], %s805_s16 }
  0x40   : > { %s280_s13 = sshll.u32 %s273_s11, 4  ;;  %p1454_p11 = pnand %p1067_p13, %p41_p0  ;;  %s1458_s13 = int_to_ptr.vmem [resolvable:$true] %s280_s13 }
  0x41   : > { %s1460_s15 = scalar_lea.sflag [#allocation3], %s269_s21  ;;  %s1189_s18 = scalar_lea.hbm %s1452_s10, 512 }
  0x42   : > { %p1190_p2 = scmp.ne.s32.totalorder %s1452_s10, %s1189_s18  ;;  %p1191_p5 = pneg %p1454_p11 }
  0x43   : > { %s1194_s16 = scalar_lea.hbm %s1571_s0, 1024  ;;  %p1195_p1 = scmp.lt.s32.totalorder %s1452_s10, %s1571_s0 }
  0x44   : > { %p1192_p10 = pnand %p1191_p5, %p1190_p2  ;;  %p1196_p12 = scmp.lt.s32.totalorder %s1194_s16, %s1189_s18 }
  0x46   : > { %p1193_p7 = pneg %p1192_p10  ;;  %p1197_p9 = por %p1196_p12, %p1195_p1 }
  0x48   : > { %p1198_p13 = pnand %p1197_p9, %p1193_p7 }
  0x4a   : > { %1201 = shalt.err (!%p1198_p13)
}
  0x4b   : > { %s1202_s21 = scalar_lea.vmem %s1458_s13, 512  ;;  %s1296_s19 = smov [#allocation2]  }
  0x4c   : > { %p1203_p0 = scmp.ne.s32.totalorder %s1458_s13, %s1202_s21  ;;  %s1207_s1 = sshll.u32 %s1296_s19, 4  ;;  %s1208_s1 = int_to_ptr.vmem [resolvable:$false] %s1207_s1 }
  0x4d   : > { %s1209_s22 = scalar_lea.vmem %s1208_s1, 1024  ;;  %p1210_p10 = scmp.lt.s32.totalorder %s1458_s13, %s1208_s1 }
  0x4e   : > { %p1205_p6 = pnand %p1203_p0, %p1191_p5  ;;  %p1211_p3 = scmp.lt.s32.totalorder %s1209_s22, %s1202_s21 }
  0x50   : > { %p1206_p2 = pneg %p1205_p6  ;;  %p1212_p4 = por %p1211_p3, %p1210_p10 }
  0x52   : > { %p1213_p8 = pnand %p1212_p4, %p1206_p2 }
  0x54   : > { %1216 = shalt.err (!%p1213_p8)
}
  0x55   : > { %s1593_s18 = smov 8   ;;  %s1594_s23 = smov 128  }
  0x56   : > { %1059 = dma.hbm_to_vmem [thread:$0]  (!%p1454_p11), %s1452_s10, 512, %s1458_s13, %s1460_s15, %s1594_s23, %s1594_s23, %s1593_s18  }
  0x57   : > { %p1595_p6 = scmp.ne.s32.totalorder %s1588_s9, 0 }
  0x58   : > { %s1487_s19 = sand.u32 (!%p1595_p6), 1, %s1281_s25   ;;  %p1596_p4 = scmp.ne.s32.totalorder (!%p1595_p6), %s1586_s30, 0 }
  0x59   : > { %292 = sbr.rel (%p1595_p6) target bundleno = 750 (0x2ee), region = 48  ;;  %s809_s1 = sshll.u32 (!%p1595_p6), %s1487_s19, 5 }
  0x5a   : > { %s295_s16 = scalar_lea.sflag (!%p1595_p6), [#allocation3], %s1487_s19  ;;  %s1493_s12 = scalar_lea.vmem (!%p1595_p6), [#allocation2], %s809_s1 }
  0x5e   : > { %1260 = dma.done.wait (%p1596_p4), %s295_s16, 512  }
  0x5f   : > { %1262 = vsyncadd (%p1596_p4), %s295_s16, 4294966784  ;;  %p1597_p8 = scmp.eq.s32.totalorder %s1361_s28, 0 }
  0x61   : > { %1264 = dma.done.wait (%p1597_p8), [#allocation6], 4096   ;;  %p1598_p3 = pmov %p1597_p8 }
  0x63   : > { %1266 = vsyncadd (%p1598_p3), [#allocation6], 4294963200  ;;  %p1599_p11 = pmov %p1598_p3 }
  0x64   : > { %p1600_p5 = pmov %p1598_p3 }
  0x65   : > { %1268 = dma.done.wait (%p1599_p11), [#allocation9], 2048  }
  0x66   : > { %1270 = vsyncadd (%p1600_p5), [#allocation9], 4294965248  ;;  %v362_v0 = vld [vmem:[#allocation5 + $0x78] sm:$0xff]  ;;  %v361_v1 = vld [vmem:[#allocation5 + $0x70] sm:$0xff]  ;;  %s340_s11 = scalar_lea.vmem [#allocation10], %s809_s1  ;;  %s823_s22 = sshll.u32 %s1361_s28, 9 }
  0x67   : > { %884 = vmatprep.subr.mxu0 %v362_v0  ;;  %v360_v2 = vld [vmem:[#allocation5 + $0x68] sm:$0xff]  ;;  %v359_v3 = vld [vmem:[#allocation5 + $0x60] sm:$0xff]  ;;  %v358_v5 = vld [vmem:[#allocation5 + $0x58] sm:$0xff]  ;;  %s697_s21 = sshll.u32 %s340_s11, 4  ;;  %s1528_s16 = scalar_lea.hbm %s1578_s7, %s823_s22  ;;  %s1523_s21 = int_to_ptr.vmem [resolvable:$true] %s697_s21 }
  0x68   : > { %885 = vmatpush3.msra.mxu0 %v362_v0  ;;  %v343_v4 = vld [vmem:[%s1493_s12] sm:$0xff]  ;;  %v474_v6 = vld [vmem:[#allocation7 + $0x78] sm:$0xff]  ;;  %v473_v7 = vld [vmem:[#allocation7 + $0x70] sm:$0xff]  ;;  %s684_s1 = scalar_lea.sflag [#allocation4], %s1487_s19  ;;  %p1601_p1 = scmp.ne.s32.totalorder %s1591_s20, 0 }
  0x69   : > { %886 = vmatprep.subr.mxu0 %v361_v1  ;;  %916 = vmatprep.mubr.f32.mxu0 %v343_v4  ;;  %v357_v8 = vld [vmem:[#allocation5 + $0x50] sm:$0xff]  ;;  %v472_v9 = vld [vmem:[#allocation7 + $0x68] sm:$0xff]  ;;  %v471_v11 = vld [vmem:[#allocation7 + $0x60] sm:$0xff]  ;;  %s1297_s28 = smov [#allocation10]  }
  0x6a   : > { %887 = vmatpush3.msra.mxu0 %v361_v1  ;;  %922 = vmatprep.subr.mxu1 %v474_v6  ;;  %v356_v10 = vld [vmem:[#allocation5 + $0x48] sm:$0xff]  ;;  %v355_v12 = vld [vmem:[#allocation5 + $0x40] sm:$0xff]  ;;  %v470_v13 = vld [vmem:[#allocation7 + $0x58] sm:$0xff]  ;;  %s1221_s30 = sshll.u32 %s1297_s28, 4  ;;  %s1222_s30 = int_to_ptr.vmem [resolvable:$false] %s1221_s30 }
  0x6b   : > { %888 = vmatprep.subr.mxu0 %v360_v2  ;;  %923 = vmatpush3.msra.mxu1 %v474_v6  ;;  %v354_v14 = vld [vmem:[#allocation5 + $0x38] sm:$0xff]  ;;  %v469_v15 = vld [vmem:[#allocation7 + $0x50] sm:$0xff]  ;;  %v468_v17 = vld [vmem:[#allocation7 + $0x48] sm:$0xff]  ;;  %s1223_s9 = scalar_lea.vmem %s1222_s30, 1024  ;;  %p1224_p13 = scmp.lt.s32.totalorder %s1523_s21, %s1222_s30 }
  0x6c   : > { %889 = vmatpush3.msra.mxu0 %v360_v2  ;;  %924 = vmatprep.subr.mxu1 %v473_v7  ;;  %v353_v16 = vld [vmem:[#allocation5 + $0x30] sm:$0xff]  ;;  %v352_v18 = vld [vmem:[#allocation5 + $0x28] sm:$0xff]  ;;  %v467_v19 = vld [vmem:[#allocation7 + $0x40] sm:$0xff] }
  0x6d   : > { %890 = vmatprep.subr.mxu0 %v359_v3  ;;  %925 = vmatpush3.msra.mxu1 %v473_v7  ;;  %v351_v20 = vld [vmem:[#allocation5 + $0x20] sm:$0xff]  ;;  %v466_v21 = vld [vmem:[#allocation7 + $0x38] sm:$0xff]  ;;  %v465_v23 = vld [vmem:[#allocation7 + $0x30] sm:$0xff] }
  0x6e   : > { %891 = vmatpush3.msra.mxu0 %v359_v3  ;;  %926 = vmatprep.subr.mxu1 %v472_v9  ;;  %v350_v22 = vld [vmem:[#allocation5 + $0x18] sm:$0xff]  ;;  %v349_v24 = vld [vmem:[#allocation5 + $0x10] sm:$0xff]  ;;  %v464_v25 = vld [vmem:[#allocation7 + $0x28] sm:$0xff] }
  0x6f   : > { %892 = vmatprep.subr.mxu0 %v358_v5  ;;  %927 = vmatpush3.msra.mxu1 %v472_v9  ;;  %v348_v26 = vld [vmem:[#allocation5 + $0x8] sm:$0xff]  ;;  %v463_v27 = vld [vmem:[#allocation7 + $0x20] sm:$0xff]  ;;  %v345_v30 = vld [vmem:[%s1493_s12 + $0x10] sm:$0xff] }
  0x70   : > { %893 = vmatpush3.msra.mxu0 %v358_v5  ;;  %928 = vmatprep.subr.mxu1 %v471_v11  ;;  %v347_v28 = vld [vmem:[#allocation5] sm:$0xff]  ;;  %v344_v29 = vld [vmem:[%s1493_s12 + $0x8] sm:$0xff]  ;;  %v346_v31 = vld [vmem:[%s1493_s12 + $0x18] sm:$0xff]  ;;  %s1217_s12 = scalar_lea.vmem %s1523_s21, 512 }
  0x71   : > { %894 = vmatprep.subr.mxu0 %v357_v8  ;;  %929 = vmatpush3.msra.mxu1 %v471_v11  ;;  %v462_v32 = vld [vmem:[#allocation7 + $0x18] sm:$0xff]  ;;  %v461_v33 = vld [vmem:[#allocation7 + $0x10] sm:$0xff]  ;;  %v460_v34 = vld [vmem:[#allocation7 + $0x8] sm:$0xff]  ;;  %p1218_p7 = scmp.ne.s32.totalorder %s1523_s21, %s1217_s12  ;;  %p1225_p0 = scmp.lt.s32.totalorder %s1223_s9, %s1217_s12 }
  0x72   : > { %895 = vmatpush3.msra.mxu0 %v357_v8  ;;  %930 = vmatprep.subr.mxu1 %v470_v13  ;;  %v459_v35 = vld [vmem:[#allocation7] sm:$0xff]  ;;  %v586_v36 = vld [vmem:[#allocation8 + $0x78] sm:$0xff]  ;;  %v585_v37 = vld [vmem:[#allocation8 + $0x70] sm:$0xff] }
  0x73   : > { %896 = vmatprep.subr.mxu0 %v356_v10  ;;  %931 = vmatpush3.msra.mxu1 %v470_v13  ;;  %v584_v38 = vld [vmem:[#allocation8 + $0x68] sm:$0xff]  ;;  %v583_v39 = vld [vmem:[#allocation8 + $0x60] sm:$0xff]  ;;  %v582_v40 = vld [vmem:[#allocation8 + $0x58] sm:$0xff]  ;;  %p1219_p12 = pnand %p1218_p7, %p1601_p1  ;;  %p1226_p2 = por %p1225_p0, %p1224_p13 }
  0x74   : > { %897 = vmatpush3.msra.mxu0 %v356_v10  ;;  %932 = vmatprep.subr.mxu1 %v469_v15  ;;  %v581_v41 = vld [vmem:[#allocation8 + $0x50] sm:$0xff]  ;;  %v580_v42 = vld [vmem:[#allocation8 + $0x48] sm:$0xff]  ;;  %v579_v43 = vld [vmem:[#allocation8 + $0x40] sm:$0xff] }
  0x75   : > { %898 = vmatprep.subr.mxu0 %v355_v12  ;;  %933 = vmatpush3.msra.mxu1 %v469_v15  ;;  %v578_v44 = vld [vmem:[#allocation8 + $0x38] sm:$0xff]  ;;  %v577_v45 = vld [vmem:[#allocation8 + $0x30] sm:$0xff]  ;;  %v576_v46 = vld [vmem:[#allocation8 + $0x28] sm:$0xff]  ;;  %p1220_p9 = pneg %p1219_p12 }
  0x76   : > { %899 = vmatpush3.msra.mxu0 %v355_v12  ;;  %934 = vmatprep.subr.mxu1 %v468_v17  ;;  %v575_v47 = vld [vmem:[#allocation8 + $0x20] sm:$0xff]  ;;  %v574_v61 = vld [vmem:[#allocation8 + $0x18] sm:$0xff]  ;;  %v573_v62 = vld [vmem:[#allocation8 + $0x10] sm:$0xff] }
  0x77   : > { %900 = vmatprep.subr.mxu0 %v354_v14  ;;  %935 = vmatpush3.msra.mxu1 %v468_v17  ;;  %v814_v48 = vld [vmem:[%s1573_s2] ss:$0 sm:$0xff]  ;;  %v572_v63 = vld [vmem:[#allocation8 + $0x8] sm:$0xff]  ;;  %p1227_p10 = pnand %p1226_p2, %p1220_p9 }
  0x78   : > { %901 = vmatpush3.msra.mxu0 %v354_v14  ;;  %936 = vmatprep.subr.mxu1 %v467_v19  ;;  %v571_v0 = vld [vmem:[#allocation8] sm:$0xff] }
  0x79   : > { %902 = vmatprep.subr.mxu0 %v353_v16  ;;  %937 = vmatpush3.msra.mxu1 %v467_v19  ;;  %v815_v1 = vld [vmem:[%s1575_s4] ss:$0 sm:$0xff] }
  0x7a   : > { %903 = vmatpush3.msra.mxu0 %v353_v16  ;;  %938 = vmatprep.subr.mxu1 %v466_v21  ;;  %v816_v14 = vld [vmem:[%s1577_s6] ss:$0 sm:$0xff] }
  0x7b   : > { %904 = vmatprep.subr.mxu0 %v352_v18  ;;  %939 = vmatpush3.msra.mxu1 %v466_v21 }
  0x7c   : > { %905 = vmatpush3.msra.mxu0 %v352_v18  ;;  %940 = vmatprep.subr.mxu1 %v465_v23 }
  0x7d   : > { %906 = vmatprep.subr.mxu0 %v351_v20  ;;  %941 = vmatpush3.msra.mxu1 %v465_v23 }
  0x7e   : > { %907 = vmatpush3.msra.mxu0 %v351_v20  ;;  %942 = vmatprep.subr.mxu1 %v464_v25 }
  0x7f   : > { %908 = vmatprep.subr.mxu0 %v350_v22  ;;  %943 = vmatpush3.msra.mxu1 %v464_v25 }
  0x80   : > { %909 = vmatpush3.msra.mxu0 %v350_v22  ;;  %944 = vmatprep.subr.mxu1 %v463_v27 }
  0x81   : > { %910 = vmatprep.subr.mxu0 %v349_v24  ;;  %945 = vmatpush3.msra.mxu1 %v463_v27 }
  0x82   : > { %911 = vmatpush3.msra.mxu0 %v349_v24  ;;  %946 = vmatprep.subr.mxu1 %v462_v32 }
  0x83   : > { %912 = vmatprep.subr.mxu0 %v348_v26  ;;  %947 = vmatpush3.msra.mxu1 %v462_v32 }
  0x84   : > { %913 = vmatpush3.msra.mxu0 %v348_v26  ;;  %948 = vmatprep.subr.mxu1 %v461_v33 }
  0x85   : > { %914 = vmatprep.subr.mxu0 %v347_v28  ;;  %949 = vmatpush3.msra.mxu1 %v461_v33 }
  0x86   : > { %915 = vmatpush3.msra.mxu0 %v347_v28  ;;  %950 = vmatprep.subr.mxu1 %v460_v34 }
  0x87   : > { %917 = vmatmul.mubr.f32.vlgmr.msra.gmra.mxu0 %v344_v29  ;;  %951 = vmatpush3.msra.mxu1 %v460_v34 }
  0x88   : > { %919 = vmatprep.mubr.f32.mxu0 %v345_v30  ;;  %952 = vmatprep.subr.mxu1 %v459_v35 }
  0x89   : > { %953 = vmatpush3.msra.mxu1 %v459_v35  ;;  %960 = vmatprep.subr.mxu0 %v586_v36 }
  0x8a   : > { %998 = vmatprep.subr.mxu1 %v586_v36  ;;  %961 = vmatpush3.msra.mxu0 %v586_v36 }
  0x8b   : > { %920 = vmatmul.mubr.f32.gmra.mxu0 %v346_v31  ;;  %962 = vmatprep.subr.mxu0 %v585_v37 }
  0x8c   : > { %963 = vmatpush3.msra.mxu0 %v585_v37 }
  0x8d   : > { %964 = vmatprep.subr.mxu0 %v584_v38 }
  0x8e   : > { %965 = vmatpush3.msra.mxu0 %v584_v38 }
  0x8f   : > { %966 = vmatprep.subr.mxu0 %v583_v39 }
  0x90   : > { %967 = vmatpush3.msra.mxu0 %v583_v39 }
  0x91   : > { %968 = vmatprep.subr.mxu0 %v582_v40 }
  0x92   : > { %969 = vmatpush3.msra.mxu0 %v582_v40 }
  0x93   : > { %970 = vmatprep.subr.mxu0 %v581_v41 }
  0x94   : > { %971 = vmatpush3.msra.mxu0 %v581_v41 }
  0x95   : > { %972 = vmatprep.subr.mxu0 %v580_v42 }
  0x96   : > { %973 = vmatpush3.msra.mxu0 %v580_v42 }
  0x97   : > { %974 = vmatprep.subr.mxu0 %v579_v43 }
  0x98   : > { %975 = vmatpush3.msra.mxu0 %v579_v43 }
  0x99   : > { %976 = vmatprep.subr.mxu0 %v578_v44 }
  0x9a   : > { %977 = vmatpush3.msra.mxu0 %v578_v44 }
  0x9b   : > { %978 = vmatprep.subr.mxu0 %v577_v45 }
  0x9c   : > { %979 = vmatpush3.msra.mxu0 %v577_v45 }
  0x9d   : > { %980 = vmatprep.subr.mxu0 %v576_v46 }
  0x9e   : > { %981 = vmatpush3.msra.mxu0 %v576_v46 }
  0x9f   : > { %982 = vmatprep.subr.mxu0 %v575_v47 }
  0xa0   : > { %983 = vmatpush3.msra.mxu0 %v575_v47 }
  0xa1   : > { %984 = vmatprep.subr.mxu0 %v574_v61 }
  0xa2   : > { %985 = vmatpush3.msra.mxu0 %v574_v61 }
  0xa3   : > { %986 = vmatprep.subr.mxu0 %v573_v62 }
  0xa4   : > { %987 = vmatpush3.msra.mxu0 %v573_v62 }
  0xa5   : > { %988 = vmatprep.subr.mxu0 %v572_v63 }
  0xa6   : > { %989 = vmatpush3.msra.mxu0 %v572_v63 }
  0xa7   : > { %990 = vmatprep.subr.mxu0 %v571_v0 }
  0xa8   : > { %991 = vmatpush3.msra.mxu0 %v571_v0 }
 0x147   : > { %v918_v49 = vpop.f32.mrf.mxu0 }
 0x148   : > { %v442_v50 = vadd.f32 %v918_v49, %v814_v48 }
 0x149   : > { %v436_v51 = vpop.f32.mrf.mxu0 }
 0x14a   : > { %v437_v52 = vadd.f32 %v814_v48, %v436_v51  ;;  %v456_v55 = vmax.f32 %v442_v50, 0.0 }
 0x14b   : > { %v921_v53 = vpop.f32.mrf.mxu0 }
 0x14c   : > { %v455_v54 = vmax.f32 %v437_v52, 0.0  ;;  %v452_v56 = vadd.f32 %v921_v53, %v814_v48 }
 0x14d   : > { %v446_v57 = vpop.f32.mrf.mxu0 }
 0x14e   : > { %v447_v58 = vadd.f32 %v814_v48, %v446_v57  ;;  %954 = vmatprep.mubr.f32.mxu1 %v455_v54  ;;  %v458_v60 = vmax.f32 %v452_v56, 0.0 }
 0x14f   : > { %955 = vmatmul.mubr.f32.vlgmr.msra.gmra.mxu1 %v456_v55 }
 0x150   : > { %v457_v59 = vmax.f32 %v447_v58, 0.0  ;;  %1014 = vmatpush3.msra.mxu1 %v586_v36 }
 0x151   : > { %999 = vmatprep.subr.mxu1 %v585_v37 }
 0x152   : > { %957 = vmatprep.mubr.f32.mxu1 %v457_v59  ;;  %1015 = vmatpush3.msra.mxu1 %v585_v37 }
 0x153   : > { %958 = vmatmul.mubr.f32.gmra.mxu1 %v458_v60  ;;  %1000 = vmatprep.subr.mxu1 %v584_v38 }
 0x154   : > { %1016 = vmatpush3.msra.mxu1 %v584_v38 }
 0x155   : > { %1001 = vmatprep.subr.mxu1 %v583_v39 }
 0x156   : > { %1017 = vmatpush3.msra.mxu1 %v583_v39 }
 0x157   : > { %1002 = vmatprep.subr.mxu1 %v582_v40 }
 0x158   : > { %1018 = vmatpush3.msra.mxu1 %v582_v40 }
 0x159   : > { %1003 = vmatprep.subr.mxu1 %v581_v41 }
 0x15a   : > { %1019 = vmatpush3.msra.mxu1 %v581_v41 }
 0x15b   : > { %1004 = vmatprep.subr.mxu1 %v580_v42 }
 0x15c   : > { %1020 = vmatpush3.msra.mxu1 %v580_v42 }
 0x15d   : > { %1005 = vmatprep.subr.mxu1 %v579_v43 }
 0x15e   : > { %1021 = vmatpush3.msra.mxu1 %v579_v43 }
 0x15f   : > { %1006 = vmatprep.subr.mxu1 %v578_v44 }
 0x160   : > { %1022 = vmatpush3.msra.mxu1 %v578_v44 }
 0x161   : > { %1007 = vmatprep.subr.mxu1 %v577_v45 }
 0x162   : > { %1023 = vmatpush3.msra.mxu1 %v577_v45 }
 0x163   : > { %1008 = vmatprep.subr.mxu1 %v576_v46 }
 0x164   : > { %1024 = vmatpush3.msra.mxu1 %v576_v46 }
 0x165   : > { %1009 = vmatprep.subr.mxu1 %v575_v47 }
 0x166   : > { %1025 = vmatpush3.msra.mxu1 %v575_v47 }
 0x167   : > { %1010 = vmatprep.subr.mxu1 %v574_v61 }
 0x168   : > { %1026 = vmatpush3.msra.mxu1 %v574_v61 }
 0x169   : > { %1011 = vmatprep.subr.mxu1 %v573_v62 }
 0x16a   : > { %1027 = vmatpush3.msra.mxu1 %v573_v62 }
 0x16b   : > { %1012 = vmatprep.subr.mxu1 %v572_v63 }
 0x16c   : > { %1028 = vmatpush3.msra.mxu1 %v572_v63 }
 0x16d   : > { %1013 = vmatprep.subr.mxu1 %v571_v0 }
 0x16e   : > { %1029 = vmatpush3.msra.mxu1 %v571_v0 }
 0x20f   : > { %v956_v2 = vpop.f32.mrf.mxu1 }
 0x210   : > { %v554_v3 = vadd.f32 %v956_v2, %v815_v1 }
 0x211   : > { %v548_v4 = vpop.f32.mrf.mxu1 }
 0x212   : > { %v549_v5 = vadd.f32 %v815_v1, %v548_v4  ;;  %v568_v8 = vmax.f32 %v554_v3, 0.0 }
 0x213   : > { %v959_v6 = vpop.f32.mrf.mxu1 }
 0x214   : > { %v567_v7 = vmax.f32 %v549_v5, 0.0  ;;  %v564_v9 = vadd.f32 %v959_v6, %v815_v1 }
 0x215   : > { %v558_v10 = vpop.f32.mrf.mxu1 }
 0x216   : > { %v559_v11 = vadd.f32 %v815_v1, %v558_v10  ;;  %992 = vmatprep.mubr.f32.mxu0 %v567_v7  ;;  %v570_v13 = vmax.f32 %v564_v9, 0.0 }
 0x217   : > { %993 = vmatmul.mubr.f32.vlgmr.msra.gmra.mxu0 %v568_v8 }
 0x218   : > { %v569_v12 = vmax.f32 %v559_v11, 0.0 }
 0x21a   : > { %995 = vmatprep.mubr.f32.mxu1 %v569_v12 }
 0x21b   : > { %996 = vmatmul.mubr.f32.vlgmr.msra.gmra.mxu1 %v570_v13 }
 0x2d7   : > { %v994_v15 = vpop.f32.mrf.mxu0 }
 0x2d8   : > { %v666_v16 = vadd.f32 %v994_v15, %v816_v14 }
 0x2d9   : > { %v660_v17 = vpop.f32.mrf.mxu0 }
 0x2da   : > { %680 = vst [vmem:[%s340_s11 + $0x8] sm:$0xff] %v666_v16  ;;  %v661_v18 = vadd.f32 %v816_v14, %v660_v17 }
 0x2db   : > { %v997_v19 = vpop.f32.mrf.mxu1 }
 0x2dc   : > { %679 = vst [vmem:[%s340_s11] sm:$0xff] %v661_v18  ;;  %v676_v20 = vadd.f32 %v997_v19, %v816_v14 }
 0x2dd   : > { %v670_v21 = vpop.f32.mrf.mxu1 }
 0x2de   : > { %682 = vst [vmem:[%s340_s11 + $0x18] sm:$0xff] %v676_v20  ;;  %v671_v22 = vadd.f32 %v816_v14, %v670_v21 }
 0x2e0   : > { %681 = vst [vmem:[%s340_s11 + $0x10] sm:$0xff] %v671_v22 }
 0x2e1   : > { %1230 = shalt.err (!%p1227_p10)
}
 0x2e2   : > { %s1231_s10 = scalar_lea.hbm %s1528_s16, 512  ;;  %s1235_s29 = scalar_lea.hbm %s1578_s7, 1024 }
 0x2e3   : > { %p1232_p6 = scmp.ne.s32.totalorder %s1528_s16, %s1231_s10  ;;  %p1236_p3 = scmp.lt.s32.totalorder %s1528_s16, %s1578_s7 }
 0x2e4   : > { %p1237_p11 = scmp.lt.s32.totalorder %s1235_s29, %s1231_s10 }
 0x2e5   : > { %p1233_p4 = pnand %p1232_p6, %p1601_p1 }
 0x2e6   : > { %p1238_p5 = por %p1237_p11, %p1236_p3 }
 0x2e7   : > { %p1234_p8 = pneg %p1233_p4 }
 0x2e9   : > { %p1239_p7 = pnand %p1238_p5, %p1234_p8 }
 0x2eb   : > { %1242 = shalt.err (!%p1239_p7)
}
 0x2ec   : > { %s1298_s18 = smov 128   ;;  %s1299_s23 = smov 8  }
 0x2ed   : > { %1044 = dma.vmem_to_hbm [thread:$0]  (%p1601_p1), %s1523_s21, 512, %s1528_s16, %s684_s1, %s1298_s18, %s1298_s18, %s1299_s23  }
 0x2ee PF: > { %s712_s12 = sand.u32 1, %s1277_s24   ;;  %p1602_p12 = scmp.ne.s32.totalorder %s1587_s8, 0 }
 0x2ef   : > { %p1603_p9 = scmp.ge.s32.totalorder %s1289_s27, 2  ;;  %s713_s28 = scalar_lea.sflag [#allocation4], %s712_s12 }
 0x2f1   : > { %p1061_p13 = pnand %p1603_p9, %p1602_p12 }
 0x2f3   : > { %p1062_p0 = pneg %p1061_p13 }
 0x2f5   : > { %1272 = dma.done.wait (%p1062_p0), %s713_s28, 512  }
 0x2f6   : > { %1274 = vsyncadd (%p1062_p0), %s713_s28, 4294966784  ;;  %p22_p2 = scmp.ge.s32.totalorder %s1429_s14, 4   ;;  %s1604_s24 = smov %s1281_s25 }
 0x2f7   : > { %s1605_s25 = smov %s1285_s26  ;;  %s1606_s26 = smov %s1439_s17 }
 0x2f8   : > { %s1607_s27 = smov %s1429_s14  ;;  %24 = sbr.rel (!%p22_p2) target bundleno = 9 (0x9), region = 105 }
 0x2fd   :  { %718 = vsyncpa [#allocation3], 1 }
 0x2fe   :  { %720 = vsyncpa [#allocation3 + $0x1], 1 }
 0x2ff   :  { %721 = vsyncpa [#allocation6], 1 }
 0x300   :  { %722 = vsyncpa [#allocation9], 1 }
 0x301   :  { %723 = vsyncpa [#allocation4], 1 }
 0x302   :  { %725 = vsyncpa [#allocation4 + $0x1], 1 }

</bundles_post_ra>
